<compile_context>
chip_gen: v7x
topology: tpu7x:2x2x1
jax: 0.10.0
libtpu: 0.0.40
codegen_flags: <defaults>
</compile_context>

<pallas_src>
import functools
import math

import jax
import jax.numpy as jnp
import numpy as np
from jax.experimental import pallas as pl
from jax.experimental.pallas import tpu as pltpu

LN_EPS = 1e-5  # torch.nn.LayerNorm default


def _layernorm(x, gamma, beta):
    mu = jnp.mean(x, axis=-1, keepdims=True)
    var = jnp.mean((x - mu) ** 2, axis=-1, keepdims=True)
    return (x - mu) * jax.lax.rsqrt(var + LN_EPS) * gamma + beta


def _gelu_exact(x):
    # torch.nn.GELU default = exact erf formulation
    return 0.5 * x * (1.0 + jax.lax.erf(x * (1.0 / math.sqrt(2.0))))


def block_kernel(x_ref,
                 g1_ref, b1_ref,
                 wq_ref, wk_ref, wv_ref,        # (H, C, Dh) bf16; wq pre-scaled by 1/sqrt(Dh)
                 wproj_ref, bproj_ref,          # (H, Dh, C) bf16, (1, C) f32
                 g2_ref, b2_ref,
                 w1_ref, bf1_ref,               # (C, hidden) bf16, (1, hidden) f32
                 w2_ref, bf2_ref,               # (hidden, C) bf16, (1, C) f32
                 o_ref,
                 *, num_heads):
    x = x_ref[0].astype(jnp.float32)            # (N, C) -- one batch element per grid step
    N, C = x.shape
    H = num_heads

    # ---------------- LayerNorm 1 (f32 statistics) ----------------
    xn = _layernorm(x, g1_ref[0], b1_ref[0])
    xn_b = xn.astype(jnp.bfloat16)

    # ---------------- Attention (head-major batched matmuls) ------
    # Broadcast the normalized tokens across the head axis once; every einsum below is a
    # plain batched matmul with a leading batch dim (no lane-axis head slicing anywhere).
    xn_h = jnp.broadcast_to(xn_b[None, :, :], (H, N, C))                       # (H, N, C)

    q = jnp.einsum('hnc,hcd->hnd', xn_h, wq_ref[...],
                   preferred_element_type=jnp.float32)                         # scale folded into Wq
    k = jnp.einsum('hnc,hcd->hnd', xn_h, wk_ref[...],
                   preferred_element_type=jnp.float32)
    v = jnp.einsum('hnc,hcd->hnd', xn_h, wv_ref[...],
                   preferred_element_type=jnp.float32)

    s = jnp.einsum('hnd,hmd->hnm', q.astype(jnp.bfloat16), k.astype(jnp.bfloat16),
                   preferred_element_type=jnp.float32)                         # (H, N, N)
    s = s - jnp.max(s, axis=-1, keepdims=True)                                 # f32 softmax
    p = jnp.exp(s)
    p = p * pl.reciprocal(jnp.sum(p, axis=-1, keepdims=True), approx=True)     # EUP, not VALU div

    ctx = jnp.einsum('hnm,hmd->hnd', p.astype(jnp.bfloat16), v.astype(jnp.bfloat16),
                     preferred_element_type=jnp.float32)                       # (H, N, Dh)

    # Output projection with the head-concat folded in: one batched (N,Dh)x(Dh,C) matmul,
    # then a static H-way add (avoids a lane-axis concat/relayout of the heads).
    part = jnp.einsum('hnd,hdc->hnc', ctx.astype(jnp.bfloat16), wproj_ref[...],
                      preferred_element_type=jnp.float32)                      # (H, N, C)
    attn_out = part[0]
    for h in range(1, H):
        attn_out = attn_out + part[h]
    attn_out = attn_out + bproj_ref[0]

    x = x + attn_out                            # residual 1

    # ---------------- LayerNorm 2 + MLP ---------------------------
    xn2 = _layernorm(x, g2_ref[0], b2_ref[0]).astype(jnp.bfloat16)
    hmid = jnp.dot(xn2, w1_ref[...], preferred_element_type=jnp.float32) + bf1_ref[0]
    hmid = _gelu_exact(hmid)                    # exact erf GELU, f32 (matches nn.GELU default)
    mlp_out = jnp.dot(hmid.astype(jnp.bfloat16), w2_ref[...],
                      preferred_element_type=jnp.float32) + bf2_ref[0]

    o_ref[0] = (x + mlp_out).astype(o_ref.dtype)   # residual 2


def vit_block(x, params, num_heads):
    B, N, C = x.shape
    H = num_heads
    Dh = C // H
    hidden = params["w1"].shape[1]
    scale = Dh ** (-0.5)

    # ---- Head-major, MXU-friendly bf16 weight layout (done once, outside the kernel) ----
    # wqkv columns are ordered [q|k|v] x head-major x Dh (same ordering torch's
    # reshape(B,N,3,H,Dh) implies), so a plain reshape extracts per-head (C, Dh) slabs.
    wqkv = params["wqkv"].reshape(C, 3, H, Dh)
    wq = (jnp.transpose(wqkv[:, 0], (1, 0, 2)) * scale).astype(jnp.bfloat16)   # (H, C, Dh)
    wk = jnp.transpose(wqkv[:, 1], (1, 0, 2)).astype(jnp.bfloat16)             # (H, C, Dh)
    wv = jnp.transpose(wqkv[:, 2], (1, 0, 2)).astype(jnp.bfloat16)             # (H, C, Dh)
    wproj = params["wproj"].reshape(H, Dh, C).astype(jnp.bfloat16)             # (H, Dh, C)
    w1 = params["w1"].astype(jnp.bfloat16)                                     # (C, hidden)
    w2 = params["w2"].astype(jnp.bfloat16)                                     # (hidden, C)

    kernel = functools.partial(block_kernel, num_heads=num_heads)

    def full(shape):
        zeros = (0,) * len(shape)
        return pl.BlockSpec(shape, lambda b, _z=zeros: _z)

    in_specs = [
        pl.BlockSpec((1, N, C), lambda b: (b, 0, 0)),   # x: one batch row per grid step
        full((1, C)), full((1, C)),                     # LN1 gamma/beta (f32)
        full((H, C, Dh)), full((H, C, Dh)), full((H, C, Dh)),   # Wq (pre-scaled), Wk, Wv
        full((H, Dh, C)), full((1, C)),                 # Wproj (head-major), bproj
        full((1, C)), full((1, C)),                     # LN2 gamma/beta (f32)
        full((C, hidden)), full((1, hidden)),           # fc1
        full((hidden, C)), full((1, C)),                # fc2
    ]

    args = (x,
            params["g1"], params["b1"],
            wq, wk, wv,
            wproj, params["bproj"],
            params["g2"], params["b2"],
            w1, params["bf1"],
            w2, params["bf2"])

    flops = int(2 * B * N * C * (4 * C + 2 * hidden) + 4 * B * N * N * C)
    transcendentals = int(B * (H * N * N + H * N + N * hidden))
    bytes_accessed = int(sum(a.size * a.dtype.itemsize for a in args)
                         + x.size * x.dtype.itemsize)

    return pl.pallas_call(
        kernel,
        out_shape=jax.ShapeDtypeStruct((B, N, C), x.dtype),
        grid=(B,),
        in_specs=in_specs,
        out_specs=pl.BlockSpec((1, N, C), lambda b: (b, 0, 0)),
        compiler_params=pltpu.CompilerParams(
            dimension_semantics=("parallel",),          # megacore-shard the batch on v7x
            vmem_limit_bytes=32 * 1024 * 1024),
        cost_estimate=pl.CostEstimate(flops=flops,
                                      transcendentals=transcendentals,
                                      bytes_accessed=bytes_accessed),
    )(*args)


def make_params(key, dim, num_heads, mlp_ratio=4.0):
    hidden = int(dim * mlp_ratio)
    ks = jax.random.split(key, 4)
    p = {
        # LayerNorm params (torch default init: ones / zeros)
        "g1": jnp.ones((1, dim), jnp.float32),
        "b1": jnp.zeros((1, dim), jnp.float32),
        "g2": jnp.ones((1, dim), jnp.float32),
        "b2": jnp.zeros((1, dim), jnp.float32),
        # Attention: qkv (no bias, qkv_bias=False default), proj (with bias)
        "wqkv": 0.05 * jax.random.normal(ks[0], (dim, 3 * dim), jnp.float32),
        "wproj": 0.05 * jax.random.normal(ks[1], (dim, dim), jnp.float32),
        "bproj": jnp.zeros((1, dim), jnp.float32),
        # MLP
        "w1": 0.05 * jax.random.normal(ks[2], (dim, hidden), jnp.float32),
        "bf1": jnp.zeros((1, hidden), jnp.float32),
        "w2": 0.05 * jax.random.normal(ks[3], (hidden, dim), jnp.float32),
        "bf2": jnp.zeros((1, dim), jnp.float32),
    }
    return p


def vit_block_ref(x, params, num_heads):
    """Pure-JAX f32 reference mirroring the PyTorch forward (eval mode)."""
    B, N, C = x.shape
    Dh = C // num_heads
    scale = Dh ** (-0.5)

    def ln(y, g, b):
        mu = jnp.mean(y, axis=-1, keepdims=True)
        var = jnp.mean((y - mu) ** 2, axis=-1, keepdims=True)
        return (y - mu) * jax.lax.rsqrt(var + LN_EPS) * g[0] + b[0]

    xn = ln(x, params["g1"], params["b1"])
    qkv = xn @ params["wqkv"]                                  # (B, N, 3C)
    qkv = qkv.reshape(B, N, 3, num_heads, Dh).transpose(2, 0, 3, 1, 4)
    q, k, v = qkv[0], qkv[1], qkv[2]                           # (B, H, N, Dh)
    attn = jnp.einsum("bhqd,bhkd->bhqk", q, k) * scale
    attn = jax.nn.softmax(attn, axis=-1)
    o = jnp.einsum("bhqk,bhkd->bhqd", attn, v)
    o = o.transpose(0, 2, 1, 3).reshape(B, N, C)
    o = o @ params["wproj"] + params["bproj"][0]
    x = x + o

    xn2 = ln(x, params["g2"], params["b2"])
    h = xn2 @ params["w1"] + params["bf1"][0]
    h = jax.nn.gelu(h, approximate=False)
    h = h @ params["w2"] + params["bf2"][0]
    return x + h


if __name__ == "__main__":
    # Small but lane-dense shapes: C and hidden multiples of 128, N multiple of 8.
    B, N, dim, num_heads = 2, 16, 128, 4      # Dh = 32, mlp hidden = 512

    key = jax.random.PRNGKey(0)
    kx, kp = jax.random.split(key)
    x = jax.random.normal(kx, (B, N, dim), jnp.float32)
    params = make_params(kp, dim, num_heads)

    out = jax.block_until_ready(vit_block(x, params, num_heads))
    ref = jax.block_until_ready(vit_block_ref(x, params, num_heads))

    # bf16 MXU inputs + approx reciprocal in softmax vs. f32 reference -> relaxed tolerance.
    np.testing.assert_allclose(np.asarray(out), np.asarray(ref), rtol=2e-2, atol=2e-2)

    print("KERNEL_OK")
</pallas_src>

<mosaic_0001>
module attributes {stable_mosaic.version = 11 : i64} {
  func.func @block_kernel(%arg0: i32, %arg1: memref<1x16x128xf32, #tpu.memory_space<vmem>>, %arg2: memref<1x128xf32, #tpu.memory_space<vmem>>, %arg3: memref<1x128xf32, #tpu.memory_space<vmem>>, %arg4: memref<4x128x32xbf16, #tpu.memory_space<vmem>>, %arg5: memref<4x128x32xbf16, #tpu.memory_space<vmem>>, %arg6: memref<4x128x32xbf16, #tpu.memory_space<vmem>>, %arg7: memref<4x32x128xbf16, #tpu.memory_space<vmem>>, %arg8: memref<1x128xf32, #tpu.memory_space<vmem>>, %arg9: memref<1x128xf32, #tpu.memory_space<vmem>>, %arg10: memref<1x128xf32, #tpu.memory_space<vmem>>, %arg11: memref<128x512xbf16, #tpu.memory_space<vmem>>, %arg12: memref<1x512xf32, #tpu.memory_space<vmem>>, %arg13: memref<512x128xbf16, #tpu.memory_space<vmem>>, %arg14: memref<1x128xf32, #tpu.memory_space<vmem>>, %arg15: memref<1x16x128xf32, #tpu.memory_space<vmem>>) attributes {dimension_semantics = [#tpu.dimension_semantics<parallel>], iteration_bounds = array<i64: 2>, scalar_prefetch = 0 : i64, scratch_operands = 0 : i64, tpu.core_type = #tpu.core_type<tc>, window_params = [{transform_indices = @transform_0, window_bounds = array<i64: 1, 16, 128>}, {pipeline_mode = #tpu.pipeline_mode<synchronous>, transform_indices = @transform_1, window_bounds = array<i64: 1, 128>}, {pipeline_mode = #tpu.pipeline_mode<synchronous>, transform_indices = @transform_2, window_bounds = array<i64: 1, 128>}, {pipeline_mode = #tpu.pipeline_mode<synchronous>, transform_indices = @transform_3, window_bounds = array<i64: 4, 128, 32>}, {pipeline_mode = #tpu.pipeline_mode<synchronous>, transform_indices = @transform_4, window_bounds = array<i64: 4, 128, 32>}, {pipeline_mode = #tpu.pipeline_mode<synchronous>, transform_indices = @transform_5, window_bounds = array<i64: 4, 128, 32>}, {pipeline_mode = #tpu.pipeline_mode<synchronous>, transform_indices = @transform_6, window_bounds = array<i64: 4, 32, 128>}, {pipeline_mode = #tpu.pipeline_mode<synchronous>, transform_indices = @transform_7, window_bounds = array<i64: 1, 128>}, {pipeline_mode = #tpu.pipeline_mode<synchronous>, transform_indices = @transform_8, window_bounds = array<i64: 1, 128>}, {pipeline_mode = #tpu.pipeline_mode<synchronous>, transform_indices = @transform_9, window_bounds = array<i64: 1, 128>}, {pipeline_mode = #tpu.pipeline_mode<synchronous>, transform_indices = @transform_10, window_bounds = array<i64: 128, 512>}, {pipeline_mode = #tpu.pipeline_mode<synchronous>, transform_indices = @transform_11, window_bounds = array<i64: 1, 512>}, {pipeline_mode = #tpu.pipeline_mode<synchronous>, transform_indices = @transform_12, window_bounds = array<i64: 512, 128>}, {pipeline_mode = #tpu.pipeline_mode<synchronous>, transform_indices = @transform_13, window_bounds = array<i64: 1, 128>}, {transform_indices = @transform_14, window_bounds = array<i64: 1, 16, 128>}]} {
    %c0 = arith.constant 0 : index
    %c0_0 = arith.constant 0 : index
    %c0_1 = arith.constant 0 : index
    %0 = vector.load %arg1[%c0, %c0_0, %c0_1] : memref<1x16x128xf32, #tpu.memory_space<vmem>>, vector<1x16x128xf32>
    %1 = vector.shape_cast %0 : vector<1x16x128xf32> to vector<16x128xf32>
    %c0_2 = arith.constant 0 : index
    %c0_3 = arith.constant 0 : index
    %2 = vector.load %arg2[%c0_2, %c0_3] : memref<1x128xf32, #tpu.memory_space<vmem>>, vector<1x128xf32>
    %3 = vector.shape_cast %2 : vector<1x128xf32> to vector<128xf32>
    %c0_4 = arith.constant 0 : index
    %c0_5 = arith.constant 0 : index
    %4 = vector.load %arg3[%c0_4, %c0_5] : memref<1x128xf32, #tpu.memory_space<vmem>>, vector<1x128xf32>
    %5 = vector.shape_cast %4 : vector<1x128xf32> to vector<128xf32>
    %cst = arith.constant dense<0.000000e+00> : vector<16xf32>
    %6 = vector.multi_reduction <add>, %1, %cst [1] : vector<16x128xf32> to vector<16xf32>
    %7 = vector.shape_cast %6 : vector<16xf32> to vector<16x1xf32>
    %cst_6 = arith.constant 1.280000e+02 : f32
    %8 = vector.broadcast %cst_6 : f32 to vector<16x1xf32>
    %9 = arith.divf %7, %8 : vector<16x1xf32>
    %10 = vector.broadcast %9 : vector<16x1xf32> to vector<16x128xf32>
    %11 = arith.subf %1, %10 : vector<16x128xf32>
    %12 = arith.mulf %11, %11 : vector<16x128xf32>
    %cst_7 = arith.constant dense<0.000000e+00> : vector<16xf32>
    %13 = vector.multi_reduction <add>, %12, %cst_7 [1] : vector<16x128xf32> to vector<16xf32>
    %14 = vector.shape_cast %13 : vector<16xf32> to vector<16x1xf32>
    %cst_8 = arith.constant 1.280000e+02 : f32
    %15 = vector.broadcast %cst_8 : f32 to vector<16x1xf32>
    %16 = arith.divf %14, %15 : vector<16x1xf32>
    %17 = vector.broadcast %9 : vector<16x1xf32> to vector<16x128xf32>
    %18 = arith.subf %1, %17 : vector<16x128xf32>
    %cst_9 = arith.constant 9.99999974E-6 : f32
    %19 = vector.broadcast %cst_9 : f32 to vector<16x1xf32>
    %20 = arith.addf %16, %19 : vector<16x1xf32>
    %21 = math.rsqrt %20 : vector<16x1xf32>
    %22 = vector.broadcast %21 : vector<16x1xf32> to vector<16x128xf32>
    %23 = arith.mulf %18, %22 : vector<16x128xf32>
    %24 = vector.shape_cast %3 : vector<128xf32> to vector<1x128xf32>
    %25 = vector.broadcast %24 : vector<1x128xf32> to vector<16x128xf32>
    %26 = arith.mulf %23, %25 : vector<16x128xf32>
    %27 = vector.shape_cast %5 : vector<128xf32> to vector<1x128xf32>
    %28 = vector.broadcast %27 : vector<1x128xf32> to vector<16x128xf32>
    %29 = arith.addf %26, %28 : vector<16x128xf32>
    %30 = arith.truncf %29 : vector<16x128xf32> to vector<16x128xbf16>
    %31 = vector.shape_cast %30 : vector<16x128xbf16> to vector<1x16x128xbf16>
    %32 = vector.shape_cast %31 : vector<1x16x128xbf16> to vector<1x16x128xbf16>
    %33 = vector.broadcast %32 : vector<1x16x128xbf16> to vector<4x16x128xbf16>
    %c0_10 = arith.constant 0 : index
    %c0_11 = arith.constant 0 : index
    %c0_12 = arith.constant 0 : index
    %34 = vector.load %arg4[%c0_10, %c0_11, %c0_12] : memref<4x128x32xbf16, #tpu.memory_space<vmem>>, vector<4x128x32xbf16>
    "tpu.trace_start"() <{level = 10 : i32, message = "hnc,hcd->hnd"}> : () -> ()
    %cst_13 = arith.constant dense<0.000000e+00> : vector<4x16x32xf32>
    %35 = tpu.matmul %33, %34, %cst_13 {dimension_numbers = #tpu.dot_dimension_numbers<[2], [1], [1], [2], [0, 0, 0, 1, 1, 2], [0], [0]>} : vector<4x16x128xbf16>, vector<4x128x32xbf16>, vector<4x16x32xf32> -> vector<4x16x32xf32>
    "tpu.trace_stop"() : () -> ()
    %c0_14 = arith.constant 0 : index
    %c0_15 = arith.constant 0 : index
    %c0_16 = arith.constant 0 : index
    %36 = vector.load %arg5[%c0_14, %c0_15, %c0_16] : memref<4x128x32xbf16, #tpu.memory_space<vmem>>, vector<4x128x32xbf16>
    "tpu.trace_start"() <{level = 10 : i32, message = "hnc,hcd->hnd"}> : () -> ()
    %cst_17 = arith.constant dense<0.000000e+00> : vector<4x16x32xf32>
    %37 = tpu.matmul %33, %36, %cst_17 {dimension_numbers = #tpu.dot_dimension_numbers<[2], [1], [1], [2], [0, 0, 0, 1, 1, 2], [0], [0]>} : vector<4x16x128xbf16>, vector<4x128x32xbf16>, vector<4x16x32xf32> -> vector<4x16x32xf32>
    "tpu.trace_stop"() : () -> ()
    %c0_18 = arith.constant 0 : index
    %c0_19 = arith.constant 0 : index
    %c0_20 = arith.constant 0 : index
    %38 = vector.load %arg6[%c0_18, %c0_19, %c0_20] : memref<4x128x32xbf16, #tpu.memory_space<vmem>>, vector<4x128x32xbf16>
    "tpu.trace_start"() <{level = 10 : i32, message = "hnc,hcd->hnd"}> : () -> ()
    %cst_21 = arith.constant dense<0.000000e+00> : vector<4x16x32xf32>
    %39 = tpu.matmul %33, %38, %cst_21 {dimension_numbers = #tpu.dot_dimension_numbers<[2], [1], [1], [2], [0, 0, 0, 1, 1, 2], [0], [0]>} : vector<4x16x128xbf16>, vector<4x128x32xbf16>, vector<4x16x32xf32> -> vector<4x16x32xf32>
    "tpu.trace_stop"() : () -> ()
    %40 = arith.truncf %35 : vector<4x16x32xf32> to vector<4x16x32xbf16>
    %41 = arith.truncf %37 : vector<4x16x32xf32> to vector<4x16x32xbf16>
    "tpu.trace_start"() <{level = 10 : i32, message = "hnd,hmd->hnm"}> : () -> ()
    %cst_22 = arith.constant dense<0.000000e+00> : vector<4x16x16xf32>
    %42 = tpu.matmul %40, %41, %cst_22 {dimension_numbers = #tpu.dot_dimension_numbers<[2], [2], [1], [1], [0, 0, 0, 1, 1, 1], [0], [0]>} : vector<4x16x32xbf16>, vector<4x16x32xbf16>, vector<4x16x16xf32> -> vector<4x16x16xf32>
    "tpu.trace_stop"() : () -> ()
    %cst_23 = arith.constant dense<0xFF800000> : vector<4x16xf32>
    %43 = vector.multi_reduction <maximumf>, %42, %cst_23 [2] : vector<4x16x16xf32> to vector<4x16xf32>
    %44 = vector.shape_cast %43 : vector<4x16xf32> to vector<4x16x1xf32>
    %45 = vector.broadcast %44 : vector<4x16x1xf32> to vector<4x16x16xf32>
    %46 = arith.subf %42, %45 : vector<4x16x16xf32>
    %47 = math.exp %46 : vector<4x16x16xf32>
    %cst_24 = arith.constant dense<0.000000e+00> : vector<4x16xf32>
    %48 = vector.multi_reduction <add>, %47, %cst_24 [2] : vector<4x16x16xf32> to vector<4x16xf32>
    %49 = vector.shape_cast %48 : vector<4x16xf32> to vector<4x16x1xf32>
    %50 = tpu.reciprocal %49 {approx = true} : vector<4x16x1xf32> -> vector<4x16x1xf32>
    %51 = vector.broadcast %50 : vector<4x16x1xf32> to vector<4x16x16xf32>
    %52 = arith.mulf %47, %51 : vector<4x16x16xf32>
    %53 = arith.truncf %52 : vector<4x16x16xf32> to vector<4x16x16xbf16>
    %54 = arith.truncf %39 : vector<4x16x32xf32> to vector<4x16x32xbf16>
    "tpu.trace_start"() <{level = 10 : i32, message = "hnm,hmd->hnd"}> : () -> ()
    %cst_25 = arith.constant dense<0.000000e+00> : vector<4x16x32xf32>
    %55 = tpu.matmul %53, %54, %cst_25 {dimension_numbers = #tpu.dot_dimension_numbers<[2], [1], [1], [2], [0, 0, 0, 1, 1, 2], [0], [0]>} : vector<4x16x16xbf16>, vector<4x16x32xbf16>, vector<4x16x32xf32> -> vector<4x16x32xf32>
    "tpu.trace_stop"() : () -> ()
    %56 = arith.truncf %55 : vector<4x16x32xf32> to vector<4x16x32xbf16>
    %c0_26 = arith.constant 0 : index
    %c0_27 = arith.constant 0 : index
    %c0_28 = arith.constant 0 : index
    %57 = vector.load %arg7[%c0_26, %c0_27, %c0_28] : memref<4x32x128xbf16, #tpu.memory_space<vmem>>, vector<4x32x128xbf16>
    "tpu.trace_start"() <{level = 10 : i32, message = "hnd,hdc->hnc"}> : () -> ()
    %cst_29 = arith.constant dense<0.000000e+00> : vector<4x16x128xf32>
    %58 = tpu.matmul %56, %57, %cst_29 {dimension_numbers = #tpu.dot_dimension_numbers<[2], [1], [1], [2], [0, 0, 0, 1, 1, 2], [0], [0]>} : vector<4x16x32xbf16>, vector<4x32x128xbf16>, vector<4x16x128xf32> -> vector<4x16x128xf32>
    "tpu.trace_stop"() : () -> ()
    %59 = vector.extract_strided_slice %58 {offsets = [0, 0, 0], sizes = [1, 16, 128], strides = [1, 1, 1]} : vector<4x16x128xf32> to vector<1x16x128xf32>
    %60 = vector.shape_cast %59 : vector<1x16x128xf32> to vector<16x128xf32>
    %61 = vector.extract_strided_slice %58 {offsets = [1, 0, 0], sizes = [1, 16, 128], strides = [1, 1, 1]} : vector<4x16x128xf32> to vector<1x16x128xf32>
    %62 = vector.shape_cast %61 : vector<1x16x128xf32> to vector<16x128xf32>
    %63 = arith.addf %60, %62 : vector<16x128xf32>
    %64 = vector.extract_strided_slice %58 {offsets = [2, 0, 0], sizes = [1, 16, 128], strides = [1, 1, 1]} : vector<4x16x128xf32> to vector<1x16x128xf32>
    %65 = vector.shape_cast %64 : vector<1x16x128xf32> to vector<16x128xf32>
    %66 = arith.addf %63, %65 : vector<16x128xf32>
    %67 = vector.extract_strided_slice %58 {offsets = [3, 0, 0], sizes = [1, 16, 128], strides = [1, 1, 1]} : vector<4x16x128xf32> to vector<1x16x128xf32>
    %68 = vector.shape_cast %67 : vector<1x16x128xf32> to vector<16x128xf32>
    %69 = arith.addf %66, %68 : vector<16x128xf32>
    %c0_30 = arith.constant 0 : index
    %c0_31 = arith.constant 0 : index
    %70 = vector.load %arg8[%c0_30, %c0_31] : memref<1x128xf32, #tpu.memory_space<vmem>>, vector<1x128xf32>
    %71 = vector.shape_cast %70 : vector<1x128xf32> to vector<128xf32>
    %72 = vector.shape_cast %71 : vector<128xf32> to vector<1x128xf32>
    %73 = vector.broadcast %72 : vector<1x128xf32> to vector<16x128xf32>
    %74 = arith.addf %69, %73 : vector<16x128xf32>
    %75 = arith.addf %1, %74 : vector<16x128xf32>
    %c0_32 = arith.constant 0 : index
    %c0_33 = arith.constant 0 : index
    %76 = vector.load %arg9[%c0_32, %c0_33] : memref<1x128xf32, #tpu.memory_space<vmem>>, vector<1x128xf32>
    %77 = vector.shape_cast %76 : vector<1x128xf32> to vector<128xf32>
    %c0_34 = arith.constant 0 : index
    %c0_35 = arith.constant 0 : index
    %78 = vector.load %arg10[%c0_34, %c0_35] : memref<1x128xf32, #tpu.memory_space<vmem>>, vector<1x128xf32>
    %79 = vector.shape_cast %78 : vector<1x128xf32> to vector<128xf32>
    %cst_36 = arith.constant dense<0.000000e+00> : vector<16xf32>
    %80 = vector.multi_reduction <add>, %75, %cst_36 [1] : vector<16x128xf32> to vector<16xf32>
    %81 = vector.shape_cast %80 : vector<16xf32> to vector<16x1xf32>
    %cst_37 = arith.constant 1.280000e+02 : f32
    %82 = vector.broadcast %cst_37 : f32 to vector<16x1xf32>
    %83 = arith.divf %81, %82 : vector<16x1xf32>
    %84 = vector.broadcast %83 : vector<16x1xf32> to vector<16x128xf32>
    %85 = arith.subf %75, %84 : vector<16x128xf32>
    %86 = arith.mulf %85, %85 : vector<16x128xf32>
    %cst_38 = arith.constant dense<0.000000e+00> : vector<16xf32>
    %87 = vector.multi_reduction <add>, %86, %cst_38 [1] : vector<16x128xf32> to vector<16xf32>
    %88 = vector.shape_cast %87 : vector<16xf32> to vector<16x1xf32>
    %cst_39 = arith.constant 1.280000e+02 : f32
    %89 = vector.broadcast %cst_39 : f32 to vector<16x1xf32>
    %90 = arith.divf %88, %89 : vector<16x1xf32>
    %91 = vector.broadcast %83 : vector<16x1xf32> to vector<16x128xf32>
    %92 = arith.subf %75, %91 : vector<16x128xf32>
    %cst_40 = arith.constant 9.99999974E-6 : f32
    %93 = vector.broadcast %cst_40 : f32 to vector<16x1xf32>
    %94 = arith.addf %90, %93 : vector<16x1xf32>
    %95 = math.rsqrt %94 : vector<16x1xf32>
    %96 = vector.broadcast %95 : vector<16x1xf32> to vector<16x128xf32>
    %97 = arith.mulf %92, %96 : vector<16x128xf32>
    %98 = vector.shape_cast %77 : vector<128xf32> to vector<1x128xf32>
    %99 = vector.broadcast %98 : vector<1x128xf32> to vector<16x128xf32>
    %100 = arith.mulf %97, %99 : vector<16x128xf32>
    %101 = vector.shape_cast %79 : vector<128xf32> to vector<1x128xf32>
    %102 = vector.broadcast %101 : vector<1x128xf32> to vector<16x128xf32>
    %103 = arith.addf %100, %102 : vector<16x128xf32>
    %104 = arith.truncf %103 : vector<16x128xf32> to vector<16x128xbf16>
    %c0_41 = arith.constant 0 : index
    %c0_42 = arith.constant 0 : index
    %105 = vector.load %arg11[%c0_41, %c0_42] : memref<128x512xbf16, #tpu.memory_space<vmem>>, vector<128x512xbf16>
    %cst_43 = arith.constant dense<0.000000e+00> : vector<16x512xf32>
    %106 = tpu.matmul %104, %105, %cst_43 {dimension_numbers = #tpu.dot_dimension_numbers<[1], [0], [0], [1], [0, 0, 1, 1], [], []>} : vector<16x128xbf16>, vector<128x512xbf16>, vector<16x512xf32> -> vector<16x512xf32>
    %c0_44 = arith.constant 0 : index
    %c0_45 = arith.constant 0 : index
    %107 = vector.load %arg12[%c0_44, %c0_45] : memref<1x512xf32, #tpu.memory_space<vmem>>, vector<1x512xf32>
    %108 = vector.shape_cast %107 : vector<1x512xf32> to vector<512xf32>
    %109 = vector.shape_cast %108 : vector<512xf32> to vector<1x512xf32>
    %110 = vector.broadcast %109 : vector<1x512xf32> to vector<16x512xf32>
    %111 = arith.addf %106, %110 : vector<16x512xf32>
    %cst_46 = arith.constant 5.000000e-01 : f32
    %112 = vector.broadcast %cst_46 : f32 to vector<16x512xf32>
    %113 = arith.mulf %112, %111 : vector<16x512xf32>
    %cst_47 = arith.constant 0.707106769 : f32
    %114 = vector.broadcast %cst_47 : f32 to vector<16x512xf32>
    %115 = arith.mulf %111, %114 : vector<16x512xf32>
    %116 = math.erf %115 : vector<16x512xf32>
    %cst_48 = arith.constant 1.000000e+00 : f32
    %117 = vector.broadcast %cst_48 : f32 to vector<16x512xf32>
    %118 = arith.addf %117, %116 : vector<16x512xf32>
    %119 = arith.mulf %113, %118 : vector<16x512xf32>
    %120 = arith.truncf %119 : vector<16x512xf32> to vector<16x512xbf16>
    %c0_49 = arith.constant 0 : index
    %c0_50 = arith.constant 0 : index
    %121 = vector.load %arg13[%c0_49, %c0_50] : memref<512x128xbf16, #tpu.memory_space<vmem>>, vector<512x128xbf16>
    %cst_51 = arith.constant dense<0.000000e+00> : vector<16x128xf32>
    %122 = tpu.matmul %120, %121, %cst_51 {dimension_numbers = #tpu.dot_dimension_numbers<[1], [0], [0], [1], [0, 0, 1, 1], [], []>} : vector<16x512xbf16>, vector<512x128xbf16>, vector<16x128xf32> -> vector<16x128xf32>
    %c0_52 = arith.constant 0 : index
    %c0_53 = arith.constant 0 : index
    %123 = vector.load %arg14[%c0_52, %c0_53] : memref<1x128xf32, #tpu.memory_space<vmem>>, vector<1x128xf32>
    %124 = vector.shape_cast %123 : vector<1x128xf32> to vector<128xf32>
    %125 = vector.shape_cast %124 : vector<128xf32> to vector<1x128xf32>
    %126 = vector.broadcast %125 : vector<1x128xf32> to vector<16x128xf32>
    %127 = arith.addf %122, %126 : vector<16x128xf32>
    %128 = arith.addf %75, %127 : vector<16x128xf32>
    %c0_54 = arith.constant 0 : index
    %c0_55 = arith.constant 0 : index
    %c0_56 = arith.constant 0 : index
    %129 = vector.load %arg15[%c0_54, %c0_55, %c0_56] : memref<1x16x128xf32, #tpu.memory_space<vmem>>, vector<1x16x128xf32>
    %130 = vector.shape_cast %129 : vector<1x16x128xf32> to vector<16x128xf32>
    %131 = vector.shape_cast %128 : vector<16x128xf32> to vector<1x16x128xf32>
    tpu.vector_store %arg15[%c0_54, %c0_55, %c0_56], %131 {strides = array<i32>} : memref<1x16x128xf32, #tpu.memory_space<vmem>>, vector<1x16x128xf32>,
    return
  }
  func.func @transform_0(%arg0: i32) -> (i32, i32, i32) {
    %c0_i32 = arith.constant 0 : i32
    %c0_i32_0 = arith.constant 0 : i32
    %c0_i32_1 = arith.constant 0 : i32
    return %arg0, %c0_i32, %c0_i32_0 : i32, i32, i32
  }
  func.func @transform_1(%arg0: i32) -> (i32, i32) {
    %c0_i32 = arith.constant 0 : i32
    %c0_i32_0 = arith.constant 0 : i32
    %c0_i32_1 = arith.constant 0 : i32
    return %c0_i32, %c0_i32_0 : i32, i32
  }
  func.func @transform_2(%arg0: i32) -> (i32, i32) {
    %c0_i32 = arith.constant 0 : i32
    %c0_i32_0 = arith.constant 0 : i32
    %c0_i32_1 = arith.constant 0 : i32
    return %c0_i32, %c0_i32_0 : i32, i32
  }
  func.func @transform_3(%arg0: i32) -> (i32, i32, i32) {
    %c0_i32 = arith.constant 0 : i32
    %c0_i32_0 = arith.constant 0 : i32
    %c0_i32_1 = arith.constant 0 : i32
    %c0_i32_2 = arith.constant 0 : i32
    return %c0_i32, %c0_i32_0, %c0_i32_1 : i32, i32, i32
  }
  func.func @transform_4(%arg0: i32) -> (i32, i32, i32) {
    %c0_i32 = arith.constant 0 : i32
    %c0_i32_0 = arith.constant 0 : i32
    %c0_i32_1 = arith.constant 0 : i32
    %c0_i32_2 = arith.constant 0 : i32
    return %c0_i32, %c0_i32_0, %c0_i32_1 : i32, i32, i32
  }
  func.func @transform_5(%arg0: i32) -> (i32, i32, i32) {
    %c0_i32 = arith.constant 0 : i32
    %c0_i32_0 = arith.constant 0 : i32
    %c0_i32_1 = arith.constant 0 : i32
    %c0_i32_2 = arith.constant 0 : i32
    return %c0_i32, %c0_i32_0, %c0_i32_1 : i32, i32, i32
  }
  func.func @transform_6(%arg0: i32) -> (i32, i32, i32) {
    %c0_i32 = arith.constant 0 : i32
    %c0_i32_0 = arith.constant 0 : i32
    %c0_i32_1 = arith.constant 0 : i32
    %c0_i32_2 = arith.constant 0 : i32
    return %c0_i32, %c0_i32_0, %c0_i32_1 : i32, i32, i32
  }
  func.func @transform_7(%arg0: i32) -> (i32, i32) {
    %c0_i32 = arith.constant 0 : i32
    %c0_i32_0 = arith.constant 0 : i32
    %c0_i32_1 = arith.constant 0 : i32
    return %c0_i32, %c0_i32_0 : i32, i32
  }
  func.func @transform_8(%arg0: i32) -> (i32, i32) {
    %c0_i32 = arith.constant 0 : i32
    %c0_i32_0 = arith.constant 0 : i32
    %c0_i32_1 = arith.constant 0 : i32
    return %c0_i32, %c0_i32_0 : i32, i32
  }
  func.func @transform_9(%arg0: i32) -> (i32, i32) {
    %c0_i32 = arith.constant 0 : i32
    %c0_i32_0 = arith.constant 0 : i32
    %c0_i32_1 = arith.constant 0 : i32
    return %c0_i32, %c0_i32_0 : i32, i32
  }
  func.func @transform_10(%arg0: i32) -> (i32, i32) {
    %c0_i32 = arith.constant 0 : i32
    %c0_i32_0 = arith.constant 0 : i32
    %c0_i32_1 = arith.constant 0 : i32
    return %c0_i32, %c0_i32_0 : i32, i32
  }
  func.func @transform_11(%arg0: i32) -> (i32, i32) {
    %c0_i32 = arith.constant 0 : i32
    %c0_i32_0 = arith.constant 0 : i32
    %c0_i32_1 = arith.constant 0 : i32
    return %c0_i32, %c0_i32_0 : i32, i32
  }
  func.func @transform_12(%arg0: i32) -> (i32, i32) {
    %c0_i32 = arith.constant 0 : i32
    %c0_i32_0 = arith.constant 0 : i32
    %c0_i32_1 = arith.constant 0 : i32
    return %c0_i32, %c0_i32_0 : i32, i32
  }
  func.func @transform_13(%arg0: i32) -> (i32, i32) {
    %c0_i32 = arith.constant 0 : i32
    %c0_i32_0 = arith.constant 0 : i32
    %c0_i32_1 = arith.constant 0 : i32
    return %c0_i32, %c0_i32_0 : i32, i32
  }
  func.func @transform_14(%arg0: i32) -> (i32, i32, i32) {
    %c0_i32 = arith.constant 0 : i32
    %c0_i32_0 = arith.constant 0 : i32
    %c0_i32_1 = arith.constant 0 : i32
    return %arg0, %c0_i32, %c0_i32_0 : i32, i32, i32
  }
}

</mosaic_0001>

<bundles_post_ra>
// kernel: tpu_custom_call.1
= control target key start
LH: loop header
LB: loop body
LE: loop exit
PB: predicated region body
PF: predicated region fallthrough
CT: control target
= control target key end

     0   :  { %s5321_s0 = inlined_call_operand.vmem [shape: f32[2,16,128], index: 0, kind: input, shape index: {}]   ;;  %s5322_s1 = inlined_call_operand.vmem [shape: f32[1,128], index: 1, kind: input, shape index: {}]   ;;  %s5323_s2 = inlined_call_operand.vmem [shape: f32[1,128], index: 2, kind: input, shape index: {}]   ;;  %s5324_s3 = inlined_call_operand.vmem [shape: bf16[4,128,32], index: 3, kind: input, shape index: {}]   ;;  %s5325_s4 = inlined_call_operand.vmem [shape: bf16[4,128,32], index: 4, kind: input, shape index: {}]   ;;  %s5326_s5 = inlined_call_operand.vmem [shape: bf16[4,128,32], index: 5, kind: input, shape index: {}]   ;;  %s5327_s6 = inlined_call_operand.vmem [shape: bf16[4,32,128], index: 6, kind: input, shape index: {}]   ;;  %s5328_s7 = inlined_call_operand.vmem [shape: f32[1,128], index: 7, kind: input, shape index: {}]   ;;  %s5329_s8 = inlined_call_operand.vmem [shape: f32[1,128], index: 8, kind: input, shape index: {}]   ;;  %s5330_s9 = inlined_call_operand.vmem [shape: f32[1,128], index: 9, kind: input, shape index: {}]   ;;  %s5331_s10 = inlined_call_operand.vmem [shape: bf16[128,512], index: 10, kind: input, shape index: {}]   ;;  %s5332_s11 = inlined_call_operand.vmem [shape: f32[1,512], index: 11, kind: input, shape index: {}]   ;;  %s5333_s12 = inlined_call_operand.vmem [shape: bf16[512,128], index: 12, kind: input, shape index: {}]   ;;  %s5334_s13 = inlined_call_operand.vmem [shape: f32[1,128], index: 13, kind: input, shape index: {}]   ;;  %s5335_s14 = inlined_call_operand.hbm [shape: f32[2,16,128], index: 14, kind: output, shape index: {}]  }
   0x1   :  { %5337 = sst [smem:[#allocation7_spill]] %s5321_s0 }
   0x2   :  { %5338 = sst [smem:[#allocation8_spill]] %s5322_s1 }
   0x3   :  { %19 = vsyncpa [#allocation3], 0 }
   0x4   :  { %21 = vsyncpa [#allocation3 + $0x1], 0  ;;  %s4443_s29 = smov 0   ;;  %s4445_s30 = smov 0  }
   0x5   :  { %s4447_s15 = smov 0   ;;  %s4449_s16 = smov 0  }
   0x6 LB: > { %5339 = sst [smem:[#allocation5_spill]] %s4356_s15  ;;  %s4464_s17 = sadd.s32 4294967295, %s4360_s16   ;;  %s4360_s16 = sphi %s4449_s16, %s5349_s16   ;;  %s4356_s15 = sphi %s4447_s15, %s5346_s15   ;;  %s4352_s30 = sphi %s4445_s30, %s5348_s30   ;;  %s4348_s29 = sphi %s4443_s29, %s5347_s29  }
   0x7   : > { %s3312_s18 = sadd.s32 4294967294, %s4360_s16   ;;  %s4468_s19 = sadd.s32 1, %s4360_s16  }
   0x8   : > { %s333_s20 = sadd.s32 1, %s4356_s15  ;;  %s330_s21 = ssub.s32 %s4360_s16, %s4468_s19 }
   0x9   : > { %p343_p0 = scmp.ne.s32.totalorder %s4356_s15, %s4352_s30  ;;  %p331_p1 = scmp.eq.s32.totalorder %s330_s21, 0 }
   0xa   : > { %p344_p2 = scmp.eq.s32.totalorder %s4464_s17, 1  ;;  %p349_p3 = scmp.ne.s32.totalorder %s4352_s30, %s4348_s29 }
   0xb   : > { %p350_p4 = scmp.eq.s32.totalorder %s3312_s18, 1  ;;  %p3315_p7 = scmp.ge.s32.totalorder %s4360_s16, 1 }
   0xc   : > { %s4479_s22 = scalar_select %p331_p1, %s4356_s15, %s333_s20  }
   0xd   : > { %p4481_p5 = por %p344_p2, %p343_p0  ;;  %p4485_p6 = por %p350_p4, %p349_p3 }
   0xe   : > { %5340 = sst [smem:[#allocation6_spill]] %s4479_s22  ;;  %p415_p8 = scmp.lt.s32.totalorder %s4360_s16, 3 }
  0x10   : > { %p416_p9 = pnand %p3315_p7, %p415_p8 }
  0x11   : > { %p461_p10 = scmp.lt.s32.totalorder (!%p416_p9), %s4464_s17, 1  ;;  %s5343_s0 = sld [smem:[#allocation7_spill]] (!%p416_p9)  ;;  %v4056_v2 = vld [vmem:[%s5324_s3] sm:$0xff] (!%p416_p9)   ;;  %v4362_v4 = vmov (!%p416_p9), 0.0   ;;  %v4058_v5 = vld [vmem:[%s5324_s3 + $0x8] sm:$0xff] (!%p416_p9)   ;;  %v4060_v15 = vld [vmem:[%s5324_s3 + $0x10] sm:$0xff] (!%p416_p9)  }
  0x12   : > { %419 = sbr.rel (%p416_p9) target bundleno = 2428 (0x97c), region = 76  ;;  %v4057_v3 = vld [vmem:[%s5324_s3 + $0x40] sm:$0xff] (!%p416_p9)   ;;  %3692 = vmatprep.subr.bf16.mxu0 (!%p416_p9), %v4362_v4  ;;  %3712 = vmatprep.subr.bf16.mxu1 (!%p416_p9), %v4362_v4  ;;  %v4059_v6 = vld [vmem:[%s5324_s3 + $0x48] sm:$0xff] (!%p416_p9)   ;;  %v4061_v16 = vld [vmem:[%s5324_s3 + $0x50] sm:$0xff] (!%p416_p9)   ;;  %vm4363_vm0 = vmmov (!%p416_p9), 0   ;;  %s5344_s1 = sld [smem:[#allocation8_spill]] (!%p416_p9) }
  0x13   : > { %3693 = vmatpush3.bf16.msra.mxu0 (!%p416_p9), %v4056_v2  ;;  %3713 = vmatpush3.bf16.msra.mxu1 (!%p416_p9), %v4057_v3  ;;  %v4062_v17 = vld [vmem:[%s5324_s3 + $0x18] sm:$0xff] (!%p416_p9)   ;;  %v4064_v19 = vld [vmem:[%s5324_s3 + $0x20] sm:$0xff] (!%p416_p9)   ;;  %v4066_v21 = vld [vmem:[%s5324_s3 + $0x28] sm:$0xff] (!%p416_p9)   ;;  %vm1779_vm1 = vcmask (!%p416_p9), 261120   ;;  %vm1968_vm2 = vcmask (!%p416_p9), 130048   ;;  %s458_s15 = sand.u32 (!%p416_p9), 1, %s4352_s30  }
  0x14   : > { %3694 = vmatprep.subr.bf16.mxu0 (!%p416_p9), %v4362_v4  ;;  %3714 = vmatprep.subr.bf16.mxu1 (!%p416_p9), %v4362_v4  ;;  %v4063_v18 = vld [vmem:[%s5324_s3 + $0x58] sm:$0xff] (!%p416_p9)   ;;  %v4065_v20 = vld [vmem:[%s5324_s3 + $0x60] sm:$0xff] (!%p416_p9)   ;;  %v4067_v22 = vld [vmem:[%s5324_s3 + $0x68] sm:$0xff] (!%p416_p9)   ;;  %s3316_s22 = sshll.u32 (!%p416_p9), %s458_s15, 4  ;;  %s5280_s28 = scalar_lea.sflag (!%p416_p9), [#allocation3], %s458_s15 }
  0x15   : > { %v4068_v23 = vld [vmem:[%s5324_s3 + $0x30] sm:$0xff] (!%p416_p9)   ;;  %v4070_v25 = vld [vmem:[%s5324_s3 + $0x38] sm:$0xff] (!%p416_p9)   ;;  %3708 = vmatprep.mubr.msk.bf16.mxu0 (!%p416_p9), %vm4363_vm0, %v4362_v4  ;;  %3728 = vmatprep.mubr.msk.bf16.mxu1 (!%p416_p9), %vm4363_vm0, %v4362_v4  ;;  %v3320_v39 = vld [vmem:[%s5323_s2] ss:$0 sm:$0xff] (!%p416_p9) }
  0x16   : > { %v4069_v24 = vld [vmem:[%s5324_s3 + $0x70] sm:$0xff] (!%p416_p9)   ;;  %v4071_v26 = vld [vmem:[%s5324_s3 + $0x78] sm:$0xff] (!%p416_p9)   ;;  %v4072_v43 = vld [vmem:[%s5324_s3 + $0x80] sm:$0xff] (!%p416_p9)  }
  0x17   : > { %3695 = vmatpush3.bf16.msra.mxu0 (!%p416_p9), %v4058_v5  ;;  %3715 = vmatpush3.bf16.msra.mxu1 (!%p416_p9), %v4059_v6  ;;  %v4073_v44 = vld [vmem:[%s5324_s3 + $0xc0] sm:$0xff] (!%p416_p9)   ;;  %v4074_v46 = vld [vmem:[%s5324_s3 + $0x88] sm:$0xff] (!%p416_p9)   ;;  %v4076_v48 = vld [vmem:[%s5324_s3 + $0x90] sm:$0xff] (!%p416_p9)  }
  0x18   : > { %3696 = vmatprep.subr.bf16.mxu0 (!%p416_p9), %v4362_v4  ;;  %3716 = vmatprep.subr.bf16.mxu1 (!%p416_p9), %v4362_v4  ;;  %v3319_v35 = vld [vmem:[%s5344_s1] ss:$0 sm:$0xff] (!%p416_p9)  ;;  %v4075_v47 = vld [vmem:[%s5324_s3 + $0xc8] sm:$0xff] (!%p416_p9)   ;;  %v4077_v49 = vld [vmem:[%s5324_s3 + $0xd0] sm:$0xff] (!%p416_p9)   ;;  %s460_s1 = scalar_lea.vmem (!%p416_p9), [#allocation2], %s3316_s22  ;;  %s4365_s22 = smov (!%p416_p9), [#allocation2]  }
  0x19   : > { %s462_s25 = scalar_select %p461_p10, %s4464_s17, 1  ;;  %v4078_v50 = vld [vmem:[%s5324_s3 + $0x98] sm:$0xff]   ;;  %v4080_v52 = vld [vmem:[%s5324_s3 + $0xa0] sm:$0xff]   ;;  %v4082_v54 = vld [vmem:[%s5324_s3 + $0xa8] sm:$0xff]  }
  0x1a   : > { %v4079_v51 = vld [vmem:[%s5324_s3 + $0xd8] sm:$0xff]   ;;  %v4081_v53 = vld [vmem:[%s5324_s3 + $0xe0] sm:$0xff]   ;;  %v4083_v55 = vld [vmem:[%s5324_s3 + $0xe8] sm:$0xff]   ;;  %s3250_s21 = sshll.u32 %s460_s1, 4  ;;  %s4302_s20 = sshll.u32 %s4365_s22, 4  ;;  %s5272_s21 = int_to_ptr.vmem [resolvable:$true] %s3250_s21  ;;  %s4303_s20 = int_to_ptr.vmem [resolvable:$false] %s4302_s20 }
  0x1b   : > { %s3510_s26 = sshll.u32 %s462_s25, 4  ;;  %3697 = vmatpush3.bf16.msra.mxu0 %v4060_v15  ;;  %3717 = vmatpush3.bf16.msra.mxu1 %v4061_v16  ;;  %v4084_v56 = vld [vmem:[%s5324_s3 + $0xb0] sm:$0xff]   ;;  %v4086_v58 = vld [vmem:[%s5324_s3 + $0xb8] sm:$0xff]   ;;  %v4088_v60 = vld [vmem:[%s5325_s4] sm:$0xff]   ;;  %s3511_s25 = sshll.u32 %s4464_s17, 8 }
  0x1c   : > { %s4496_s18 = scalar_lea.vmem %s5343_s0, %s3510_s26  ;;  %3698 = vmatprep.subr.bf16.mxu0 %v4362_v4  ;;  %3718 = vmatprep.subr.bf16.mxu1 %v4362_v4  ;;  %v4085_v57 = vld [vmem:[%s5324_s3 + $0xf0] sm:$0xff]   ;;  %v4087_v59 = vld [vmem:[%s5324_s3 + $0xf8] sm:$0xff]   ;;  %v4089_v61 = vld [vmem:[%s5325_s4 + $0x40] sm:$0xff]   ;;  %s5278_s27 = scalar_lea.hbm %s5335_s14, %s3511_s25 }
  0x1d   : > { %v467_v0 = vld [vmem:[%s4496_s18] sm:$0xff]  ;;  %v468_v1 = vld [vmem:[%s4496_s18 + $0x8] sm:$0xff]  ;;  %v4094_v2 = vld [vmem:[%s5325_s4 + $0x18] sm:$0xff]   ;;  %s4298_s17 = scalar_lea.vmem %s5272_s21, 256  ;;  %s4304_s0 = scalar_lea.vmem %s4303_s20, 512 }
  0x1e   : > { %471 = vadd.xlane.f32.xlu0 %v467_v0  ;;  %v4090_v62 = vld [vmem:[%s5325_s4 + $0x8] sm:$0xff]   ;;  %v4095_v3 = vld [vmem:[%s5325_s4 + $0x58] sm:$0xff]   ;;  %v4096_v5 = vld [vmem:[%s5325_s4 + $0x20] sm:$0xff]   ;;  %p4299_p11 = scmp.ne.s32.totalorder %s5272_s21, %s4298_s17  ;;  %p4305_p0 = scmp.lt.s32.totalorder %s5272_s21, %s4303_s20 }
  0x1f   : > { %3699 = vmatpush3.bf16.msra.mxu0 %v4062_v17  ;;  %3719 = vmatpush3.bf16.msra.mxu1 %v4063_v18  ;;  %v4091_v63 = vld [vmem:[%s5325_s4 + $0x48] sm:$0xff]   ;;  %v4097_v6 = vld [vmem:[%s5325_s4 + $0x60] sm:$0xff]   ;;  %v4108_v17 = vld [vmem:[%s5325_s4 + $0x90] sm:$0xff]   ;;  %p4306_p1 = scmp.lt.s32.totalorder %s4304_s0, %s4298_s17 }
  0x20   : > { %3700 = vmatprep.subr.bf16.mxu0 %v4362_v4  ;;  %3720 = vmatprep.subr.bf16.mxu1 %v4362_v4  ;;  %v4106_v15 = vld [vmem:[%s5325_s4 + $0x88] sm:$0xff]   ;;  %v4109_v18 = vld [vmem:[%s5325_s4 + $0xd0] sm:$0xff]   ;;  %p4300_p12 = pnand %p4299_p11, %p4481_p5 }
  0x21   : > { %v4107_v16 = vld [vmem:[%s5325_s4 + $0xc8] sm:$0xff]   ;;  %p4307_p2 = por %p4306_p1, %p4305_p0 }
  0x22   : > { %473 = vadd.xlane.f32.xlu0 %v468_v1  ;;  %p4301_p13 = pneg %p4300_p12 }
  0x23   : > { %3701 = vmatpush3.bf16.msra.mxu0 %v4064_v19  ;;  %3721 = vmatpush3.bf16.msra.mxu1 %v4065_v20  ;;  %v4110_v19 = vld [vmem:[%s5325_s4 + $0x98] sm:$0xff]  }
  0x24   : > { %3702 = vmatprep.subr.bf16.mxu0 %v4362_v4  ;;  %3722 = vmatprep.subr.bf16.mxu1 %v4362_v4  ;;  %v4111_v20 = vld [vmem:[%s5325_s4 + $0xd8] sm:$0xff]   ;;  %p4308_p3 = pnand %p4307_p2, %p4301_p13 }
  0x27   : > { %3703 = vmatpush3.bf16.msra.mxu0 %v4066_v21  ;;  %3723 = vmatpush3.bf16.msra.mxu1 %v4067_v22  ;;  %v4112_v21 = vld [vmem:[%s5325_s4 + $0xa0] sm:$0xff]  }
  0x28   : > { %3704 = vmatprep.subr.bf16.mxu0 %v4362_v4  ;;  %3724 = vmatprep.subr.bf16.mxu1 %v4362_v4  ;;  %v4113_v22 = vld [vmem:[%s5325_s4 + $0xe0] sm:$0xff]  }
  0x2b   : > { %3705 = vmatpush3.bf16.msra.mxu0 %v4068_v23  ;;  %3725 = vmatpush3.bf16.msra.mxu1 %v4069_v24  ;;  %v4114_v23 = vld [vmem:[%s5325_s4 + $0xa8] sm:$0xff]  }
  0x2c   : > { %3706 = vmatprep.subr.bf16.mxu0 %v4362_v4  ;;  %3726 = vmatprep.subr.bf16.mxu1 %v4362_v4  ;;  %v4115_v24 = vld [vmem:[%s5325_s4 + $0xe8] sm:$0xff]  }
  0x2f   : > { %3707 = vmatpush3.bf16.msra.mxu0 %v4070_v25  ;;  %3727 = vmatpush3.bf16.msra.mxu1 %v4071_v26  ;;  %v4116_v25 = vld [vmem:[%s5325_s4 + $0xb0] sm:$0xff]  }
  0x30   : > { %3732 = vmatprep.subr.bf16.mxu0 %v4362_v4  ;;  %3752 = vmatprep.subr.bf16.mxu1 %v4362_v4  ;;  %v4117_v26 = vld [vmem:[%s5325_s4 + $0xf0] sm:$0xff]  }
  0xab   : > { %v472_v7 = vpop.xlane.xlu0 %471 }
  0xac   : > { %v476_v8 = vmul.f32 0.0078125, %v472_v7  ;;  %v4098_v7 = vld [vmem:[%s5325_s4 + $0x28] sm:$0xff]  }
  0xae   : > { %v478_v9 = vsub.f32 %v467_v0, %v476_v8  ;;  %v4092_v0 = vld [vmem:[%s5325_s4 + $0x10] sm:$0xff]   ;;  %v4099_v8 = vld [vmem:[%s5325_s4 + $0x68] sm:$0xff]  }
  0xaf   : > { %v474_v10 = vpop.xlane.xlu0 %473 }
  0xb0   : > { %v477_v11 = vmul.f32 0.0078125, %v474_v10  ;;  %v480_v12 = vmul.f32 %v478_v9, %v478_v9  ;;  %v4101_v10 = vld [vmem:[%s5325_s4 + $0x70] sm:$0xff]  }
  0xb2   : > { %v479_v13 = vsub.f32 %v468_v1, %v477_v11  ;;  %482 = vadd.xlane.f32.xlu1 %v480_v12  ;;  %v4093_v1 = vld [vmem:[%s5325_s4 + $0x50] sm:$0xff]   ;;  %v4102_v11 = vld [vmem:[%s5325_s4 + $0x38] sm:$0xff]  }
  0xb3   : > { %v4103_v12 = vld [vmem:[%s5325_s4 + $0x78] sm:$0xff]  }
  0xb4   : > { %v481_v14 = vmul.f32 %v479_v13, %v479_v13 }
  0xb6   : > { %484 = vadd.xlane.f32.xlu1 %v481_v14  ;;  %v4105_v14 = vld [vmem:[%s5325_s4 + $0xc0] sm:$0xff]  }
 0x13f   : > { %v483_v27 = vpop.xlane.xlu1 %482 }
 0x140   : > { %v486_v28 = vmul.f32 0.0078125, %v483_v27  ;;  %v4118_v27 = vld [vmem:[%s5325_s4 + $0xb8] sm:$0xff]  }
 0x142   : > { %v488_v29 = vadd.f32 1e-05, %v486_v28  ;;  %v4119_v28 = vld [vmem:[%s5325_s4 + $0xf8] sm:$0xff]  }
 0x143   : > { %v485_v30 = vpop.xlane.xlu1 %484 }
 0x144   : > { %4240 = vrsqrt.f32 %v488_v29  ;;  %v487_v31 = vmul.f32 0.0078125, %v485_v30  ;;  %v4120_v29 = vld [vmem:[%s5326_s5] sm:$0xff]  }
 0x145   : > { %v4121_v30 = vld [vmem:[%s5326_s5 + $0x40] sm:$0xff]  }
 0x146   : > { %v489_v32 = vadd.f32 1e-05, %v487_v31  ;;  %v4122_v31 = vld [vmem:[%s5326_s5 + $0x8] sm:$0xff]  }
 0x148   : > { %4242 = vrsqrt.f32 %v489_v32  ;;  %v4123_v32 = vld [vmem:[%s5326_s5 + $0x48] sm:$0xff]  }
 0x14e   : > { %v4241_v33 = vpop.eup %4240 }
 0x14f   : > { %v492_v34 = vmul.f32 %v4241_v33, %v478_v9  ;;  %v4100_v9 = vld [vmem:[%s5325_s4 + $0x30] sm:$0xff]  }
 0x150   : > { %v4124_v33 = vld [vmem:[%s5326_s5 + $0x10] sm:$0xff]  }
 0x151   : > { %v500_v37 = vmul.f32 %v3319_v35, %v492_v34  ;;  %v4125_v34 = vld [vmem:[%s5326_s5 + $0x50] sm:$0xff]  }
 0x152   : > { %v4243_v36 = vpop.eup %4242 }
 0x153   : > { %v493_v38 = vmul.f32 %v4243_v36, %v479_v13  ;;  %v508_v41 = vadd.f32 %v3320_v39, %v500_v37  ;;  %v4104_v13 = vld [vmem:[%s5325_s4 + $0x80] sm:$0xff]   ;;  %v4127_v36 = vld [vmem:[%s5326_s5 + $0x58] sm:$0xff]  }
 0x154   : > { %v4128_v37 = vld [vmem:[%s5326_s5 + $0x20] sm:$0xff]  }
 0x155   : > { %v501_v40 = vmul.f32 %v3319_v35, %v493_v38  ;;  %v4126_v35 = vld [vmem:[%s5326_s5 + $0x18] sm:$0xff]   ;;  %v4129_v38 = vld [vmem:[%s5326_s5 + $0x60] sm:$0xff]  }
 0x157   : > { %v509_v42 = vadd.f32 %v3320_v39, %v501_v40  ;;  %v4130_v39 = vld [vmem:[%s5326_s5 + $0x28] sm:$0xff]  }
 0x158   : > { %v4131_v40 = vld [vmem:[%s5326_s5 + $0x68] sm:$0xff]  }
 0x159   : > { %v4582_v45 = vpack.c.bf16 %v509_v42, %v508_v41  ;;  %v4132_v41 = vld [vmem:[%s5326_s5 + $0x30] sm:$0xff]  }
 0x15a   : > { %v4133_v42 = vld [vmem:[%s5326_s5 + $0x70] sm:$0xff]  }
 0x15b   : > { %3709 = vmatmul.mubr.bf16.vlgmr.msra.gmra.mrb[0].mxu0 %v4582_v45  ;;  %3729 = vmatmul.mubr.bf16.vlgmr.msra.gmra.mrb[0].mxu1 %v4582_v45 }
 0x15c   : > { %3733 = vmatpush3.bf16.msra.mxu0 %v4072_v43  ;;  %3753 = vmatpush3.bf16.msra.mxu1 %v4073_v44  ;;  %v4134_v43 = vld [vmem:[%s5326_s5 + $0x38] sm:$0xff]  }
 0x15d   : > { %3734 = vmatprep.subr.bf16.mxu0 %v4362_v4  ;;  %3754 = vmatprep.subr.bf16.mxu1 %v4362_v4  ;;  %v4135_v44 = vld [vmem:[%s5326_s5 + $0x78] sm:$0xff]  }
 0x15e   : > { %3748 = vmatprep.mubr.msk.bf16.mxu0 %vm4363_vm0, %v4362_v4  ;;  %3768 = vmatprep.mubr.msk.bf16.mxu1 %vm4363_vm0, %v4362_v4 }
 0x160   : > { %3735 = vmatpush3.bf16.msra.mxu0 %v4074_v46  ;;  %3755 = vmatpush3.bf16.msra.mxu1 %v4075_v47  ;;  %v4136_v46 = vld [vmem:[%s5326_s5 + $0x80] sm:$0xff]  }
 0x161   : > { %3736 = vmatprep.subr.bf16.mxu0 %v4362_v4  ;;  %3756 = vmatprep.subr.bf16.mxu1 %v4362_v4  ;;  %v4137_v47 = vld [vmem:[%s5326_s5 + $0xc0] sm:$0xff]  }
 0x164   : > { %3737 = vmatpush3.bf16.msra.mxu0 %v4076_v48  ;;  %3757 = vmatpush3.bf16.msra.mxu1 %v4077_v49  ;;  %v4138_v48 = vld [vmem:[%s5326_s5 + $0x88] sm:$0xff]  }
 0x165   : > { %3738 = vmatprep.subr.bf16.mxu0 %v4362_v4  ;;  %3758 = vmatprep.subr.bf16.mxu1 %v4362_v4  ;;  %v4139_v49 = vld [vmem:[%s5326_s5 + $0xc8] sm:$0xff]  }
 0x168   : > { %3739 = vmatpush3.bf16.msra.mxu0 %v4078_v50  ;;  %3759 = vmatpush3.bf16.msra.mxu1 %v4079_v51  ;;  %v4140_v50 = vld [vmem:[%s5326_s5 + $0x90] sm:$0xff]  }
 0x169   : > { %3740 = vmatprep.subr.bf16.mxu0 %v4362_v4  ;;  %3760 = vmatprep.subr.bf16.mxu1 %v4362_v4  ;;  %v4141_v51 = vld [vmem:[%s5326_s5 + $0xd0] sm:$0xff]  }
 0x16c   : > { %3741 = vmatpush3.bf16.msra.mxu0 %v4080_v52  ;;  %3761 = vmatpush3.bf16.msra.mxu1 %v4081_v53  ;;  %v4142_v52 = vld [vmem:[%s5326_s5 + $0x98] sm:$0xff]  }
 0x16d   : > { %3742 = vmatprep.subr.bf16.mxu0 %v4362_v4  ;;  %3762 = vmatprep.subr.bf16.mxu1 %v4362_v4  ;;  %v4143_v53 = vld [vmem:[%s5326_s5 + $0xd8] sm:$0xff]  }
 0x170   : > { %3743 = vmatpush3.bf16.msra.mxu0 %v4082_v54  ;;  %3763 = vmatpush3.bf16.msra.mxu1 %v4083_v55  ;;  %v4144_v54 = vld [vmem:[%s5326_s5 + $0xa0] sm:$0xff]  }
 0x171   : > { %3744 = vmatprep.subr.bf16.mxu0 %v4362_v4  ;;  %3764 = vmatprep.subr.bf16.mxu1 %v4362_v4  ;;  %v4145_v55 = vld [vmem:[%s5326_s5 + $0xe0] sm:$0xff]  }
 0x174   : > { %3745 = vmatpush3.bf16.msra.mxu0 %v4084_v56  ;;  %3765 = vmatpush3.bf16.msra.mxu1 %v4085_v57  ;;  %v4146_v56 = vld [vmem:[%s5326_s5 + $0xa8] sm:$0xff]  }
 0x175   : > { %3746 = vmatprep.subr.bf16.mxu0 %v4362_v4  ;;  %3766 = vmatprep.subr.bf16.mxu1 %v4362_v4  ;;  %v4147_v57 = vld [vmem:[%s5326_s5 + $0xe8] sm:$0xff]  }
 0x178   : > { %3747 = vmatpush3.bf16.msra.mxu0 %v4086_v58  ;;  %3767 = vmatpush3.bf16.msra.mxu1 %v4087_v59  ;;  %v4148_v58 = vld [vmem:[%s5326_s5 + $0xb0] sm:$0xff]  }
 0x179   : > { %3772 = vmatprep.subr.bf16.mxu0 %v4362_v4  ;;  %3792 = vmatprep.subr.bf16.mxu1 %v4362_v4  ;;  %v4149_v59 = vld [vmem:[%s5326_s5 + $0xf0] sm:$0xff]  }
 0x17b   : > { %3749 = vmatmul.mubr.bf16.vlgmr.msra.gmra.mrb[4].mxu0 %v4582_v45  ;;  %3769 = vmatmul.mubr.bf16.vlgmr.msra.gmra.mrb[4].mxu1 %v4582_v45 }
 0x17c   : > { %3773 = vmatpush3.bf16.msra.mxu0 %v4088_v60  ;;  %3793 = vmatpush3.bf16.msra.mxu1 %v4089_v61  ;;  %v4150_v60 = vld [vmem:[%s5326_s5 + $0xb8] sm:$0xff]  }
 0x17d   : > { %3774 = vmatprep.subr.bf16.mxu0 %v4362_v4  ;;  %3794 = vmatprep.subr.bf16.mxu1 %v4362_v4  ;;  %v4151_v61 = vld [vmem:[%s5326_s5 + $0xf8] sm:$0xff]  }
 0x17e   : > { %3788 = vmatprep.mubr.msk.bf16.mxu0 %vm4363_vm0, %v4362_v4  ;;  %3808 = vmatprep.mubr.msk.bf16.mxu1 %vm4363_vm0, %v4362_v4 }
 0x180   : > { %3775 = vmatpush3.bf16.msra.mxu0 %v4090_v62  ;;  %3795 = vmatpush3.bf16.msra.mxu1 %v4091_v63 }
 0x181   : > { %3776 = vmatprep.subr.bf16.mxu0 %v4362_v4  ;;  %3796 = vmatprep.subr.bf16.mxu1 %v4362_v4 }
 0x184   : > { %3777 = vmatpush3.bf16.msra.mxu0 %v4092_v0  ;;  %3797 = vmatpush3.bf16.msra.mxu1 %v4093_v1 }
 0x185   : > { %3778 = vmatprep.subr.bf16.mxu0 %v4362_v4  ;;  %3798 = vmatprep.subr.bf16.mxu1 %v4362_v4 }
 0x188   : > { %3779 = vmatpush3.bf16.msra.mxu0 %v4094_v2  ;;  %3799 = vmatpush3.bf16.msra.mxu1 %v4095_v3 }
 0x189   : > { %3780 = vmatprep.subr.bf16.mxu0 %v4362_v4  ;;  %3800 = vmatprep.subr.bf16.mxu1 %v4362_v4 }
 0x18c   : > { %3781 = vmatpush3.bf16.msra.mxu0 %v4096_v5  ;;  %3801 = vmatpush3.bf16.msra.mxu1 %v4097_v6 }
 0x18d   : > { %3782 = vmatprep.subr.bf16.mxu0 %v4362_v4  ;;  %3802 = vmatprep.subr.bf16.mxu1 %v4362_v4 }
 0x190   : > { %3783 = vmatpush3.bf16.msra.mxu0 %v4098_v7  ;;  %3803 = vmatpush3.bf16.msra.mxu1 %v4099_v8 }
 0x191   : > { %3784 = vmatprep.subr.bf16.mxu0 %v4362_v4  ;;  %3804 = vmatprep.subr.bf16.mxu1 %v4362_v4 }
 0x194   : > { %3785 = vmatpush3.bf16.msra.mxu0 %v4100_v9  ;;  %3805 = vmatpush3.bf16.msra.mxu1 %v4101_v10 }
 0x195   : > { %3786 = vmatprep.subr.bf16.mxu0 %v4362_v4  ;;  %3806 = vmatprep.subr.bf16.mxu1 %v4362_v4 }
 0x198   : > { %3787 = vmatpush3.bf16.msra.mxu0 %v4102_v11  ;;  %3807 = vmatpush3.bf16.msra.mxu1 %v4103_v12 }
 0x199   : > { %3812 = vmatprep.subr.bf16.mxu0 %v4362_v4  ;;  %3832 = vmatprep.subr.bf16.mxu1 %v4362_v4 }
 0x19b   : > { %3789 = vmatmul.mubr.bf16.vlgmr.msra.gmra.mrb[8].mxu0 %v4582_v45  ;;  %3809 = vmatmul.mubr.bf16.vlgmr.msra.gmra.mrb[8].mxu1 %v4582_v45 }
 0x19c   : > { %3813 = vmatpush3.bf16.msra.mxu0 %v4104_v13  ;;  %3833 = vmatpush3.bf16.msra.mxu1 %v4105_v14 }
 0x19d   : > { %3814 = vmatprep.subr.bf16.mxu0 %v4362_v4  ;;  %3834 = vmatprep.subr.bf16.mxu1 %v4362_v4 }
 0x19e   : > { %3828 = vmatprep.mubr.msk.bf16.mxu0 %vm4363_vm0, %v4362_v4  ;;  %3848 = vmatprep.mubr.msk.bf16.mxu1 %vm4363_vm0, %v4362_v4 }
 0x1a0   : > { %3815 = vmatpush3.bf16.msra.mxu0 %v4106_v15  ;;  %3835 = vmatpush3.bf16.msra.mxu1 %v4107_v16 }
 0x1a1   : > { %3816 = vmatprep.subr.bf16.mxu0 %v4362_v4  ;;  %3836 = vmatprep.subr.bf16.mxu1 %v4362_v4 }
 0x1a4   : > { %3817 = vmatpush3.bf16.msra.mxu0 %v4108_v17  ;;  %3837 = vmatpush3.bf16.msra.mxu1 %v4109_v18 }
 0x1a5   : > { %3818 = vmatprep.subr.bf16.mxu0 %v4362_v4  ;;  %3838 = vmatprep.subr.bf16.mxu1 %v4362_v4 }
 0x1a8   : > { %3819 = vmatpush3.bf16.msra.mxu0 %v4110_v19  ;;  %3839 = vmatpush3.bf16.msra.mxu1 %v4111_v20 }
 0x1a9   : > { %3820 = vmatprep.subr.bf16.mxu0 %v4362_v4  ;;  %3840 = vmatprep.subr.bf16.mxu1 %v4362_v4 }
 0x1ac   : > { %3821 = vmatpush3.bf16.msra.mxu0 %v4112_v21  ;;  %3841 = vmatpush3.bf16.msra.mxu1 %v4113_v22 }
 0x1ad   : > { %3822 = vmatprep.subr.bf16.mxu0 %v4362_v4  ;;  %3842 = vmatprep.subr.bf16.mxu1 %v4362_v4 }
 0x1b0   : > { %3823 = vmatpush3.bf16.msra.mxu0 %v4114_v23  ;;  %3843 = vmatpush3.bf16.msra.mxu1 %v4115_v24 }
 0x1b1   : > { %3824 = vmatprep.subr.bf16.mxu0 %v4362_v4  ;;  %3844 = vmatprep.subr.bf16.mxu1 %v4362_v4 }
 0x1b4   : > { %3825 = vmatpush3.bf16.msra.mxu0 %v4116_v25  ;;  %3845 = vmatpush3.bf16.msra.mxu1 %v4117_v26 }
 0x1b5   : > { %3826 = vmatprep.subr.bf16.mxu0 %v4362_v4  ;;  %3846 = vmatprep.subr.bf16.mxu1 %v4362_v4 }
 0x1b8   : > { %3827 = vmatpush3.bf16.msra.mxu0 %v4118_v27  ;;  %3847 = vmatpush3.bf16.msra.mxu1 %v4119_v28 }
 0x1b9   : > { %3852 = vmatprep.subr.bf16.mxu0 %v4362_v4  ;;  %3872 = vmatprep.subr.bf16.mxu1 %v4362_v4 }
 0x1bb   : > { %3829 = vmatmul.mubr.bf16.vlgmr.msra.gmra.mrb[12].mxu0 %v4582_v45  ;;  %3849 = vmatmul.mubr.bf16.vlgmr.msra.gmra.mrb[12].mxu1 %v4582_v45 }
 0x1bc   : > { %3853 = vmatpush3.bf16.msra.mxu0 %v4120_v29  ;;  %3873 = vmatpush3.bf16.msra.mxu1 %v4121_v30 }
 0x1bd   : > { %3854 = vmatprep.subr.bf16.mxu0 %v4362_v4  ;;  %3874 = vmatprep.subr.bf16.mxu1 %v4362_v4 }
 0x1be   : > { %3868 = vmatprep.mubr.msk.bf16.mxu0 %vm4363_vm0, %v4362_v4  ;;  %3888 = vmatprep.mubr.msk.bf16.mxu1 %vm4363_vm0, %v4362_v4 }
 0x1c0   : > { %3855 = vmatpush3.bf16.msra.mxu0 %v4122_v31  ;;  %3875 = vmatpush3.bf16.msra.mxu1 %v4123_v32 }
 0x1c1   : > { %3856 = vmatprep.subr.bf16.mxu0 %v4362_v4  ;;  %3876 = vmatprep.subr.bf16.mxu1 %v4362_v4 }
 0x1c4   : > { %3857 = vmatpush3.bf16.msra.mxu0 %v4124_v33  ;;  %3877 = vmatpush3.bf16.msra.mxu1 %v4125_v34 }
 0x1c5   : > { %3858 = vmatprep.subr.bf16.mxu0 %v4362_v4  ;;  %3878 = vmatprep.subr.bf16.mxu1 %v4362_v4 }
 0x1c8   : > { %3859 = vmatpush3.bf16.msra.mxu0 %v4126_v35  ;;  %3879 = vmatpush3.bf16.msra.mxu1 %v4127_v36 }
 0x1c9   : > { %3860 = vmatprep.subr.bf16.mxu0 %v4362_v4  ;;  %3880 = vmatprep.subr.bf16.mxu1 %v4362_v4 }
 0x1cc   : > { %3861 = vmatpush3.bf16.msra.mxu0 %v4128_v37  ;;  %3881 = vmatpush3.bf16.msra.mxu1 %v4129_v38 }
 0x1cd   : > { %3862 = vmatprep.subr.bf16.mxu0 %v4362_v4  ;;  %3882 = vmatprep.subr.bf16.mxu1 %v4362_v4 }
 0x1d0   : > { %3863 = vmatpush3.bf16.msra.mxu0 %v4130_v39  ;;  %3883 = vmatpush3.bf16.msra.mxu1 %v4131_v40 }
 0x1d1   : > { %3864 = vmatprep.subr.bf16.mxu0 %v4362_v4  ;;  %3884 = vmatprep.subr.bf16.mxu1 %v4362_v4 }
 0x1d4   : > { %3865 = vmatpush3.bf16.msra.mxu0 %v4132_v41  ;;  %3885 = vmatpush3.bf16.msra.mxu1 %v4133_v42 }
 0x1d5   : > { %3866 = vmatprep.subr.bf16.mxu0 %v4362_v4  ;;  %3886 = vmatprep.subr.bf16.mxu1 %v4362_v4 }
 0x1d8   : > { %3867 = vmatpush3.bf16.msra.mxu0 %v4134_v43  ;;  %3887 = vmatpush3.bf16.msra.mxu1 %v4135_v44 }
 0x1d9   : > { %3892 = vmatprep.subr.bf16.mxu0 %v4362_v4  ;;  %3912 = vmatprep.subr.bf16.mxu1 %v4362_v4 }
 0x1db   : > { %3869 = vmatmul.mubr.bf16.vlgmr.msra.gmra.mrb[16].mxu0 %v4582_v45  ;;  %3889 = vmatmul.mubr.bf16.vlgmr.msra.gmra.mrb[16].mxu1 %v4582_v45 }
 0x1dc   : > { %3893 = vmatpush3.bf16.msra.mxu0 %v4136_v46  ;;  %3913 = vmatpush3.bf16.msra.mxu1 %v4137_v47 }
 0x1dd   : > { %3894 = vmatprep.subr.bf16.mxu0 %v4362_v4  ;;  %3914 = vmatprep.subr.bf16.mxu1 %v4362_v4 }
 0x1de   : > { %3908 = vmatprep.mubr.msk.bf16.mxu0 %vm4363_vm0, %v4362_v4  ;;  %3928 = vmatprep.mubr.msk.bf16.mxu1 %vm4363_vm0, %v4362_v4 }
 0x1e0   : > { %3895 = vmatpush3.bf16.msra.mxu0 %v4138_v48  ;;  %3915 = vmatpush3.bf16.msra.mxu1 %v4139_v49 }
 0x1e1   : > { %3896 = vmatprep.subr.bf16.mxu0 %v4362_v4  ;;  %3916 = vmatprep.subr.bf16.mxu1 %v4362_v4 }
 0x1e4   : > { %3897 = vmatpush3.bf16.msra.mxu0 %v4140_v50  ;;  %3917 = vmatpush3.bf16.msra.mxu1 %v4141_v51 }
 0x1e5   : > { %3898 = vmatprep.subr.bf16.mxu0 %v4362_v4  ;;  %3918 = vmatprep.subr.bf16.mxu1 %v4362_v4 }
 0x1e8   : > { %3899 = vmatpush3.bf16.msra.mxu0 %v4142_v52  ;;  %3919 = vmatpush3.bf16.msra.mxu1 %v4143_v53 }
 0x1e9   : > { %3900 = vmatprep.subr.bf16.mxu0 %v4362_v4  ;;  %3920 = vmatprep.subr.bf16.mxu1 %v4362_v4 }
 0x1ec   : > { %3901 = vmatpush3.bf16.msra.mxu0 %v4144_v54  ;;  %3921 = vmatpush3.bf16.msra.mxu1 %v4145_v55 }
 0x1ed   : > { %3902 = vmatprep.subr.bf16.mxu0 %v4362_v4  ;;  %3922 = vmatprep.subr.bf16.mxu1 %v4362_v4 }
 0x1f0   : > { %3903 = vmatpush3.bf16.msra.mxu0 %v4146_v56  ;;  %3923 = vmatpush3.bf16.msra.mxu1 %v4147_v57 }
 0x1f1   : > { %3904 = vmatprep.subr.bf16.mxu0 %v4362_v4  ;;  %3924 = vmatprep.subr.bf16.mxu1 %v4362_v4 }
 0x1f4   : > { %3905 = vmatpush3.bf16.msra.mxu0 %v4148_v58  ;;  %3925 = vmatpush3.bf16.msra.mxu1 %v4149_v59 }
 0x1f5   : > { %3906 = vmatprep.subr.bf16.mxu0 %v4362_v4  ;;  %3926 = vmatprep.subr.bf16.mxu1 %v4362_v4 }
 0x1f8   : > { %3907 = vmatpush3.bf16.msra.mxu0 %v4150_v60  ;;  %3927 = vmatpush3.bf16.msra.mxu1 %v4151_v61 }
 0x1f9   : > { %3932 = vmatprep.subr.bf16.mxu0 %v4362_v4  ;;  %3938 = vmatprep.subr.bf16.mxu1 %v4362_v4 }
 0x1fb   : > { %3909 = vmatmul.mubr.bf16.vlgmr.msra.gmra.mrb[20].mxu0 %v4582_v45  ;;  %3929 = vmatmul.mubr.bf16.vlgmr.msra.gmra.mrb[20].mxu1 %v4582_v45 }
 0x1fc   : > { %3934 = vmatprep.mubr.msk.bf16.mxu0 %vm4363_vm0, %v4362_v4  ;;  %3940 = vmatprep.mubr.msk.bf16.mxu1 %vm4363_vm0, %v4362_v4 }
 0x22e   : > { %v657_v62 = vpop.f32.mrb[0].mxu0  ;;  %v746_v63 = vpop.f32.mrb[0].mxu1 }
 0x22f   : > { %v3710_v0 = vpop.f32.mrb[1].mxu0  ;;  %v3730_v1 = vpop.f32.mrb[1].mxu1 }
 0x230   : > { %v660_v2 = vpop.f32.mrb[2].mxu0  ;;  %v749_v3 = vpop.f32.mrb[2].mxu1 }
 0x231   : > { %v1771_v5 = vpack.c.bf16 %v660_v2, %v657_v62  ;;  %v1772_v6 = vpack.c.bf16 %v749_v3, %v746_v63  ;;  %v3711_v7 = vpop.f32.mrb[3].mxu0  ;;  %v3731_v8 = vpop.f32.mrb[3].mxu1 }
 0x24e   : > { %v835_v9 = vpop.f32.mrb[4].mxu0  ;;  %v924_v10 = vpop.f32.mrb[4].mxu1 }
 0x24f   : > { %v3750_v11 = vpop.f32.mrb[5].mxu0  ;;  %v3770_v45 = vpop.f32.mrb[5].mxu1 }
 0x250   : > { %v838_v12 = vpop.f32.mrb[6].mxu0  ;;  %v927_v13 = vpop.f32.mrb[6].mxu1 }
 0x251   : > { %v1773_v14 = vpack.c.bf16 %v838_v12, %v835_v9  ;;  %v1774_v15 = vpack.c.bf16 %v927_v13, %v924_v10  ;;  %v3751_v16 = vpop.f32.mrb[7].mxu0  ;;  %v3771_v17 = vpop.f32.mrb[7].mxu1 }
 0x26e   : > { %v1077_v18 = vpop.f32.mrb[8].mxu0  ;;  %v1166_v19 = vpop.f32.mrb[8].mxu1 }
 0x26f   : > { %v3790_v20 = vpop.f32.mrb[9].mxu0  ;;  %v3810_v21 = vpop.f32.mrb[9].mxu1 }
 0x270   : > { %v1080_v22 = vpop.f32.mrb[10].mxu0  ;;  %v1169_v23 = vpop.f32.mrb[10].mxu1 }
 0x271   : > { %v1775_v24 = vpack.c.bf16 %v1080_v22, %v1077_v18  ;;  %v1776_v25 = vpack.c.bf16 %v1169_v23, %v1166_v19  ;;  %v3791_v26 = vpop.f32.mrb[11].mxu0  ;;  %v3811_v27 = vpop.f32.mrb[11].mxu1 }
 0x273   : > { %v1784_v28 = vsel %vm1779_vm1, %v1775_v24, 0  ;;  %v1831_v29 = vsel %vm1779_vm1, %v1776_v25, 0 }
 0x274   : > { %3933 = vmatpush3.bf16.xpose.msra.mxu0 %v1784_v28  ;;  %3939 = vmatpush3.bf16.xpose.msra.mxu1 %v1831_v29 }
 0x275   : > { %3944 = vmatprep.subr.bf16.mxu0 %v4362_v4  ;;  %3950 = vmatprep.subr.bf16.mxu1 %v4362_v4 }
 0x27b   : > { %3935 = vmatmul.mubr.msk.bf16.vlgmr.msra.gmra.mrb[24].mxu0 %vm1779_vm1, %v1771_v5  ;;  %3941 = vmatmul.mubr.msk.bf16.vlgmr.msra.gmra.mrb[24].mxu1 %vm1779_vm1, %v1772_v6 }
 0x27c   : > { %3946 = vmatprep.mubr.msk.bf16.mxu0 %vm4363_vm0, %v4362_v4  ;;  %3952 = vmatprep.mubr.msk.bf16.mxu1 %vm4363_vm0, %v4362_v4 }
 0x28e   : > { %v1255_v30 = vpop.f32.mrb[12].mxu0  ;;  %v1344_v31 = vpop.f32.mrb[12].mxu1 }
 0x28f   : > { %v3830_v32 = vpop.f32.mrb[13].mxu0  ;;  %v3850_v33 = vpop.f32.mrb[13].mxu1 }
 0x290   : > { %v1258_v34 = vpop.f32.mrb[14].mxu0  ;;  %v1347_v35 = vpop.f32.mrb[14].mxu1 }
 0x291   : > { %v1777_v36 = vpack.c.bf16 %v1258_v34, %v1255_v30  ;;  %v1778_v37 = vpack.c.bf16 %v1347_v35, %v1344_v31  ;;  %v3831_v38 = vpop.f32.mrb[15].mxu0  ;;  %v3851_v39 = vpop.f32.mrb[15].mxu1 }
 0x293   : > { %v1878_v40 = vsel %vm1779_vm1, %v1777_v36, 0  ;;  %v1925_v41 = vsel %vm1779_vm1, %v1778_v37, 0 }
 0x294   : > { %3945 = vmatpush3.bf16.xpose.msra.mxu0 %v1878_v40  ;;  %3951 = vmatpush3.bf16.xpose.msra.mxu1 %v1925_v41 }
 0x295   : > { %3956 = vmatprep.subr.bf16.mxu0 %v4362_v4  ;;  %3962 = vmatprep.subr.bf16.mxu1 %v4362_v4 }
 0x29b   : > { %3947 = vmatmul.mubr.msk.bf16.vlgmr.msra.gmra.mrb[28].mxu0 %vm1779_vm1, %v1773_v14  ;;  %3953 = vmatmul.mubr.msk.bf16.vlgmr.msra.gmra.mrb[28].mxu1 %vm1779_vm1, %v1774_v15 }
 0x29c   : > { %3958 = vmatprep.mubr.msk.bf16.mxu0 %vm4363_vm0, %v4362_v4  ;;  %3964 = vmatprep.mubr.msk.bf16.mxu1 %vm4363_vm0, %v4362_v4 }
 0x2ae   : > { %v1497_v42 = vpop.f32.mrb[16].mxu0  ;;  %v1586_v43 = vpop.f32.mrb[16].mxu1 }
 0x2af   : > { %v3870_v44 = vpop.f32.mrb[17].mxu0  ;;  %v3890_v46 = vpop.f32.mrb[17].mxu1 }
 0x2b0   : > { %v1500_v47 = vpop.f32.mrb[18].mxu0  ;;  %v1589_v48 = vpop.f32.mrb[18].mxu1 }
 0x2b1   : > { %v2061_v49 = vpack.c.bf16 %v1500_v47, %v1497_v42  ;;  %v2062_v50 = vpack.c.bf16 %v1589_v48, %v1586_v43  ;;  %v3871_v51 = vpop.f32.mrb[19].mxu0  ;;  %v3891_v52 = vpop.f32.mrb[19].mxu1 }
 0x2b3   : > { %3957 = vmatpush3.bf16.msra.mxu0 %v2061_v49  ;;  %3963 = vmatpush3.bf16.msra.mxu1 %v2062_v50 }
 0x2b4   : > { %3968 = vmatprep.subr.bf16.mxu0 %v4362_v4  ;;  %3974 = vmatprep.subr.bf16.mxu1 %v4362_v4 }
 0x2ce   : > { %v4956_v53 = vpop.f32.mrb[20].mxu0  ;;  %v4958_v54 = vpop.f32.mrb[20].mxu1 }
 0x2cf   : > { %v3910_v55 = vpop.f32.mrb[21].mxu0  ;;  %v3930_v56 = vpop.f32.mrb[21].mxu1 }
 0x2d0   : > { %v4960_v57 = vpop.f32.mrb[22].mxu0  ;;  %v4962_v58 = vpop.f32.mrb[22].mxu1 }
 0x2d1   : > { %v2063_v59 = vpack.c.bf16 %v4960_v57, %v4956_v53  ;;  %v2064_v60 = vpack.c.bf16 %v4962_v58, %v4958_v54  ;;  %v3911_v61 = vpop.f32.mrb[23].mxu0  ;;  %v3931_v62 = vpop.f32.mrb[23].mxu1  ;;  %v4152_v54 = vld [vmem:[%s5327_s6] sm:$0xff]  }
 0x34e   : > { %v1820_v63 = vpop.f32.mrb[24].mxu0  ;;  %v1867_v0 = vpop.f32.mrb[24].mxu1 }
 0x34f   : > { %v3936_v1 = vpop.f32.mrb[25].mxu0  ;;  %v3942_v2 = vpop.f32.mrb[25].mxu1  ;;  %v1969_v3 = vsel %vm1968_vm2, %v1820_v63, -inf  ;;  %v1975_v10 = vsel %vm1968_vm2, %v1867_v0, -inf }
 0x350   : > { %v1870_v5 = vpop.f32.mrb[26].mxu1  ;;  %1970 = vmax.xlane.f32.xlu0 %v1969_v3  ;;  %v1823_v6 = vpop.f32.mrb[26].mxu0 }
 0x351   : > { %v3937_v7 = vpop.f32.mrb[27].mxu0  ;;  %v3943_v8 = vpop.f32.mrb[27].mxu1  ;;  %v1972_v9 = vsel %vm1968_vm2, %v1823_v6, -inf  ;;  %v1978_v11 = vsel %vm1968_vm2, %v1870_v5, -inf }
 0x352   : > { %1973 = vmax.xlane.f32.xlu1 %v1972_v9 }
 0x354   : > { %1976 = vmax.xlane.f32.xlu0 %v1975_v10 }
 0x356   : > { %1979 = vmax.xlane.f32.xlu1 %v1978_v11 }
 0x36e   : > { %v1914_v45 = vpop.f32.mrb[28].mxu0  ;;  %v1961_v12 = vpop.f32.mrb[28].mxu1 }
 0x36f   : > { %v3948_v13 = vpop.f32.mrb[29].mxu0  ;;  %v3954_v14 = vpop.f32.mrb[29].mxu1  ;;  %v1981_v15 = vsel %vm1968_vm2, %v1914_v45, -inf  ;;  %v1987_v21 = vsel %vm1968_vm2, %v1961_v12, -inf }
 0x370   : > { %v1964_v16 = vpop.f32.mrb[30].mxu1  ;;  %1982 = vmax.xlane.f32.xlu0 %v1981_v15  ;;  %v1917_v17 = vpop.f32.mrb[30].mxu0 }
 0x371   : > { %v3949_v18 = vpop.f32.mrb[31].mxu0  ;;  %v3955_v19 = vpop.f32.mrb[31].mxu1  ;;  %v1984_v20 = vsel %vm1968_vm2, %v1917_v17, -inf  ;;  %v1990_v22 = vsel %vm1968_vm2, %v1964_v16, -inf }
 0x372   : > { %1985 = vmax.xlane.f32.xlu1 %v1984_v20 }
 0x374   : > { %1988 = vmax.xlane.f32.xlu0 %v1987_v21 }
 0x376   : > { %1991 = vmax.xlane.f32.xlu1 %v1990_v22 }
 0x3dd   : > { %v1971_v23 = vpop.xlane.xlu0 %1970 }
 0x3de   : > { %v1993_v24 = vsub.f32 %v1820_v63, %v1971_v23 }
 0x3df   : > { %v1974_v25 = vpop.xlane.xlu1 %1973 }
 0x3e0   : > { %v2001_v26 = vmul.f32 1.442695, %v1993_v24  ;;  %v1994_v27 = vsub.f32 %v1823_v6, %v1974_v25 }
 0x3e1   : > { %v1977_v28 = vpop.xlane.xlu0 %1976 }
 0x3e2   : > { %4244 = vpow2.f32 %v2001_v26  ;;  %v2003_v29 = vmul.f32 1.442695, %v1994_v27  ;;  %v1995_v30 = vsub.f32 %v1867_v0, %v1977_v28 }
 0x3e3   : > { %v1980_v31 = vpop.xlane.xlu1 %1979 }
 0x3e4   : > { %4246 = vpow2.f32 %v2003_v29  ;;  %v2005_v32 = vmul.f32 1.442695, %v1995_v30  ;;  %v1996_v33 = vsub.f32 %v1870_v5, %v1980_v31  ;;  %v4153_v29 = vld [vmem:[%s5327_s6 + $0x8] sm:$0xff]   ;;  %v4154_v30 = vld [vmem:[%s5327_s6 + $0x10] sm:$0xff]   ;;  %v4155_v31 = vld [vmem:[%s5327_s6 + $0x18] sm:$0xff]  }
 0x3e6   : > { %4248 = vpow2.f32 %v2005_v32  ;;  %v2007_v34 = vmul.f32 1.442695, %v1996_v33 }
 0x3e8   : > { %4250 = vpow2.f32 %v2007_v34 }
 0x3ec   : > { %v4245_v35 = vpop.eup %4244 }
 0x3ed   : > { %v2017_v36 = vsel %vm1968_vm2, %v4245_v35, 0.0 }
 0x3ee   : > { %v4247_v37 = vpop.eup %4246  ;;  %2018 = vadd.xlane.f32.xlu0 %v2017_v36 }
 0x3ef   : > { %v2020_v38 = vsel %vm1968_vm2, %v4247_v37, 0.0 }
 0x3f0   : > { %v4249_v39 = vpop.eup %4248  ;;  %2021 = vadd.xlane.f32.xlu1 %v2020_v38 }
 0x3f1   : > { %v2023_v40 = vsel %vm1968_vm2, %v4249_v39, 0.0 }
 0x3f2   : > { %v4251_v41 = vpop.eup %4250  ;;  %2024 = vadd.xlane.f32.xlu0 %v2023_v40 }
 0x3f3   : > { %v2026_v42 = vsel %vm1968_vm2, %v4251_v41, 0.0 }
 0x3f4   : > { %2027 = vadd.xlane.f32.xlu1 %v2026_v42  ;;  %v4158_v42 = vld [vmem:[%s5327_s6 + $0x30] sm:$0xff]  }
 0x3fd   : > { %v1983_v43 = vpop.xlane.xlu0 %1982 }
 0x3fe   : > { %v1997_v44 = vsub.f32 %v1914_v45, %v1983_v43 }
 0x3ff   : > { %v1986_v46 = vpop.xlane.xlu1 %1985 }
 0x400   : > { %v2009_v47 = vmul.f32 1.442695, %v1997_v44  ;;  %v1998_v48 = vsub.f32 %v1917_v17, %v1986_v46  ;;  %v4159_v46 = vld [vmem:[%s5327_s6 + $0x38] sm:$0xff]  }
 0x401   : > { %v1989_v49 = vpop.xlane.xlu0 %1988 }
 0x402   : > { %4252 = vpow2.f32 %v2009_v47  ;;  %v2011_v50 = vmul.f32 1.442695, %v1998_v48  ;;  %v1999_v51 = vsub.f32 %v1961_v12, %v1989_v49 }
 0x403   : > { %v1992_v52 = vpop.xlane.xlu1 %1991 }
 0x404   : > { %4254 = vpow2.f32 %v2011_v50  ;;  %v2013_v55 = vmul.f32 1.442695, %v1999_v51  ;;  %v2000_v56 = vsub.f32 %v1964_v16, %v1992_v52 }
 0x406   : > { %4256 = vpow2.f32 %v2013_v55  ;;  %v2015_v61 = vmul.f32 1.442695, %v2000_v56 }
 0x408   : > { %4258 = vpow2.f32 %v2015_v61 }
 0x40c   : > { %v4253_v62 = vpop.eup %4252 }
 0x40d   : > { %v2029_v63 = vsel %vm1968_vm2, %v4253_v62, 0.0 }
 0x40e   : > { %v4255_v0 = vpop.eup %4254  ;;  %2030 = vadd.xlane.f32.xlu0 %v2029_v63 }
 0x40f   : > { %v2032_v1 = vsel %vm1968_vm2, %v4255_v0, 0.0 }
 0x410   : > { %v4257_v2 = vpop.eup %4256  ;;  %2033 = vadd.xlane.f32.xlu1 %v2032_v1 }
 0x411   : > { %v2035_v3 = vsel %vm1968_vm2, %v4257_v2, 0.0 }
 0x412   : > { %v4259_v5 = vpop.eup %4258  ;;  %2036 = vadd.xlane.f32.xlu0 %v2035_v3 }
 0x413   : > { %v2038_v6 = vsel %vm1968_vm2, %v4259_v5, 0.0 }
 0x414   : > { %2039 = vadd.xlane.f32.xlu1 %v2038_v6 }
 0x47b   : > { %v2019_v7 = vpop.xlane.xlu0 %2018 }
 0x47c   : > { %4260 = vrcp.f32 %v2019_v7 }
 0x47d   : > { %v2022_v8 = vpop.xlane.xlu1 %2021 }
 0x47e   : > { %4262 = vrcp.f32 %v2022_v8 }
 0x47f   : > { %v2025_v9 = vpop.xlane.xlu0 %2024 }
 0x480   : > { %4264 = vrcp.f32 %v2025_v9 }
 0x481   : > { %v2028_v10 = vpop.xlane.xlu1 %2027 }
 0x482   : > { %4266 = vrcp.f32 %v2028_v10 }
 0x486   : > { %v4261_v11 = vpop.eup %4260 }
 0x487   : > { %v2049_v12 = vmul.f32 %v4261_v11, %v4245_v35  ;;  %v4156_v35 = vld [vmem:[%s5327_s6 + $0x20] sm:$0xff]  }
 0x488   : > { %v4263_v45 = vpop.eup %4262 }
 0x489   : > { %v2050_v13 = vmul.f32 %v4263_v45, %v4247_v37 }
 0x48a   : > { %v4265_v14 = vpop.eup %4264 }
 0x48b   : > { %v2057_v15 = vpack.c.bf16 %v2050_v13, %v2049_v12  ;;  %v2051_v17 = vmul.f32 %v4265_v14, %v4249_v39 }
 0x48c   : > { %v4267_v16 = vpop.eup %4266 }
 0x48d   : > { %v2052_v18 = vmul.f32 %v4267_v16, %v4251_v41  ;;  %3959 = vmatmul.mubr.msk.bf16.vlgmr.msra.gmra.mrb[32].mxu0 %vm1968_vm2, %v2057_v15  ;;  %v4157_v41 = vld [vmem:[%s5327_s6 + $0x28] sm:$0xff]   ;;  %v3437_v15 = vld [vmem:[%s5328_s7] ss:$0 sm:$0xff] }
 0x48e   : > { %3969 = vmatpush3.bf16.msra.mxu0 %v2063_v59  ;;  %3970 = vmatprep.mubr.msk.bf16.mxu0 %vm4363_vm0, %v4362_v4 }
 0x48f   : > { %v2058_v19 = vpack.c.bf16 %v2052_v18, %v2051_v17  ;;  %3980 = vmatprep.subr.bf16.mxu0 %v4362_v4 }
 0x491   : > { %3965 = vmatmul.mubr.msk.bf16.vlgmr.msra.gmra.mrb[32].mxu1 %vm1968_vm2, %v2058_v19 }
 0x492   : > { %3975 = vmatpush3.bf16.msra.mxu1 %v2064_v60  ;;  %3976 = vmatprep.mubr.msk.bf16.mxu1 %vm4363_vm0, %v4362_v4 }
 0x493   : > { %3988 = vmatprep.subr.bf16.mxu1 %v4362_v4 }
 0x49b   : > { %v2031_v20 = vpop.xlane.xlu0 %2030 }
 0x49c   : > { %4268 = vrcp.f32 %v2031_v20 }
 0x49d   : > { %v2034_v53 = vpop.xlane.xlu1 %2033 }
 0x49e   : > { %4270 = vrcp.f32 %v2034_v53 }
 0x49f   : > { %v2037_v57 = vpop.xlane.xlu0 %2036 }
 0x4a0   : > { %4272 = vrcp.f32 %v2037_v57 }
 0x4a1   : > { %v2040_v59 = vpop.xlane.xlu1 %2039 }
 0x4a2   : > { %4274 = vrcp.f32 %v2040_v59  ;;  %v4296_v59 = vld [vmem:[%s4496_s18] sm:$0xff] }
 0x4a6   : > { %v4269_v21 = vpop.eup %4268 }
 0x4a7   : > { %v2053_v23 = vmul.f32 %v4269_v21, %v4253_v62 }
 0x4a8   : > { %v4271_v22 = vpop.eup %4270 }
 0x4a9   : > { %v2054_v24 = vmul.f32 %v4271_v22, %v4255_v0  ;;  %v4297_v22 = vld [vmem:[%s4496_s18 + $0x8] sm:$0xff] }
 0x4aa   : > { %v4273_v25 = vpop.eup %4272 }
 0x4ab   : > { %v2059_v58 = vpack.c.bf16 %v2054_v24, %v2053_v23  ;;  %v2055_v26 = vmul.f32 %v4273_v25, %v4257_v2  ;;  %v4160_v24 = vld [vmem:[%s5331_s10] ss:$16 sps:$4 sm:$0xff]   ;;  %v4162_v25 = vld [vmem:[%s5331_s10 + $0x4] ss:$16 sps:$4 sm:$0xff]  }
 0x4ac   : > { %v4275_v60 = vpop.eup %4274 }
 0x4ad   : > { %v2056_v27 = vmul.f32 %v4275_v60, %v4259_v5  ;;  %3971 = vmatmul.mubr.msk.bf16.vlgmr.msra.gmra.mrb[36].mxu0 %vm1968_vm2, %v2059_v58  ;;  %v4165_v58 = vld [vmem:[%s5331_s10 + $0xc] ss:$16 sps:$4 sm:$0xff]   ;;  %v4168_v60 = vld [vmem:[%s5331_s10 + $0x24] ss:$16 sps:$4 sm:$0xff]  }
 0x4ae   : > { %3981 = vmatpush3.bf16.msra.mxu0 %v4152_v54  ;;  %3984 = vmatprep.mubr.msk.bf16.mxu0 %vm4363_vm0, %v4362_v4  ;;  %v4163_v54 = vld [vmem:[%s5331_s10 + $0x8] ss:$16 sps:$4 sm:$0xff]  }
 0x4af   : > { %v2060_v28 = vpack.c.bf16 %v2056_v27, %v2055_v26  ;;  %3982 = vmatprep.subr.bf16.mxu0 %v4362_v4  ;;  %v4171_v26 = vld [vmem:[%s5331_s10 + $0x2c] ss:$16 sps:$4 sm:$0xff]   ;;  %v4166_v27 = vld [vmem:[%s5331_s10 + $0x20] ss:$16 sps:$4 sm:$0xff]  }
 0x4b1   : > { %3977 = vmatmul.mubr.msk.bf16.vlgmr.msra.gmra.mrb[36].mxu1 %vm1968_vm2, %v2060_v28  ;;  %v4169_v28 = vld [vmem:[%s5331_s10 + $0x28] ss:$16 sps:$4 sm:$0xff]  }
 0x4b2   : > { %3992 = vmatprep.mubr.msk.bf16.mxu1 %vm4363_vm0, %v4362_v4  ;;  %3983 = vmatpush3.bf16.msra.mxu0 %v4153_v29 }
 0x4b3   : > { %3989 = vmatpush3.bf16.msra.mxu1 %v4154_v30  ;;  %3996 = vmatprep.subr.bf16.mxu0 %v4362_v4 }
 0x4b4   : > { %3990 = vmatprep.subr.bf16.mxu1 %v4362_v4 }
 0x4b7   : > { %3991 = vmatpush3.bf16.msra.mxu1 %v4155_v31 }
 0x4b8   : > { %4004 = vmatprep.subr.bf16.mxu1 %v4362_v4 }
 0x560   : > { %v2102_v32 = vpop.f32.mrb[32].mxu0 }
 0x561   : > { %v3960_v33 = vpop.f32.mrb[33].mxu0 }
 0x562   : > { %v2105_v34 = vpop.f32.mrb[34].mxu0 }
 0x563   : > { %v2241_v36 = vpack.c.bf16 %v2105_v34, %v2102_v32  ;;  %v3961_v37 = vpop.f32.mrb[35].mxu0 }
 0x564   : > { %v2146_v38 = vpop.f32.mrb[32].mxu1  ;;  %v4174_v37 = vld [vmem:[%s5331_s10 + $0x44] ss:$16 sps:$4 sm:$0xff]  }
 0x565   : > { %v3966_v39 = vpop.f32.mrb[33].mxu1  ;;  %3985 = vmatmul.mubr.msk.bf16.vlgmr.msra.gmra.mrb[40].mxu0 %vm1779_vm1, %v2241_v36 }
 0x566   : > { %v2149_v40 = vpop.f32.mrb[34].mxu1  ;;  %3997 = vmatpush3.bf16.msra.mxu0 %v4156_v35  ;;  %4000 = vmatprep.mubr.msk.bf16.mxu0 %vm4363_vm0, %v4362_v4  ;;  %v4172_v39 = vld [vmem:[%s5331_s10 + $0x40] ss:$16 sps:$4 sm:$0xff]  }
 0x567   : > { %v2242_v43 = vpack.c.bf16 %v2149_v40, %v2146_v38  ;;  %v3967_v44 = vpop.f32.mrb[35].mxu1  ;;  %3998 = vmatprep.subr.bf16.mxu0 %v4362_v4  ;;  %v4177_v38 = vld [vmem:[%s5331_s10 + $0x4c] ss:$16 sps:$4 sm:$0xff]   ;;  %v4175_v40 = vld [vmem:[%s5331_s10 + $0x48] ss:$16 sps:$4 sm:$0xff]  }
 0x568   : > { %v4181_v44 = vld [vmem:[%s5331_s10 + $0x68] ss:$16 sps:$4 sm:$0xff]  }
 0x569   : > { %3993 = vmatmul.mubr.msk.bf16.vlgmr.msra.gmra.mrb[40].mxu1 %vm1779_vm1, %v2242_v43  ;;  %v4178_v43 = vld [vmem:[%s5331_s10 + $0x60] ss:$16 sps:$4 sm:$0xff]  }
 0x56a   : > { %3999 = vmatpush3.bf16.msra.mxu0 %v4157_v41  ;;  %4005 = vmatpush3.bf16.msra.mxu1 %v4158_v42  ;;  %v4180_v41 = vld [vmem:[%s5331_s10 + $0x64] ss:$16 sps:$4 sm:$0xff]   ;;  %v4183_v42 = vld [vmem:[%s5331_s10 + $0x6c] ss:$16 sps:$4 sm:$0xff]  }
 0x56b   : > { %4006 = vmatprep.subr.bf16.mxu1 %v4362_v4  ;;  %4008 = vmatprep.mubr.msk.bf16.mxu1 %vm4363_vm0, %v4362_v4 }
 0x56c   : > { %2757 = vmatprep.subr.bf16.mxu0 %v4162_v25  ;;  %v4213_v25 = vld [vmem:[%s5333_s12 + $0xc8] sm:$0xff]  }
 0x56e   : > { %4007 = vmatpush3.bf16.msra.mxu1 %v4159_v46  ;;  %v4186_v46 = vld [vmem:[%s5331_s10 + $0x84] ss:$16 sps:$4 sm:$0xff]  }
 0x56f   : > { %2800 = vmatprep.subr.bf16.mxu1 %v4165_v58  ;;  %v4215_v58 = vld [vmem:[%s5333_s12 + $0x88] sm:$0xff]  }
 0x580   : > { %v2190_v47 = vpop.f32.mrb[36].mxu0 }
 0x581   : > { %v3972_v48 = vpop.f32.mrb[37].mxu0 }
 0x582   : > { %v2193_v49 = vpop.f32.mrb[38].mxu0  ;;  %v4184_v48 = vld [vmem:[%s5331_s10 + $0x80] ss:$16 sps:$4 sm:$0xff]  }
 0x583   : > { %v2243_v50 = vpack.c.bf16 %v2193_v49, %v2190_v47  ;;  %v3973_v51 = vpop.f32.mrb[39].mxu0  ;;  %v4189_v47 = vld [vmem:[%s5331_s10 + $0x8c] ss:$16 sps:$4 sm:$0xff]   ;;  %v4187_v49 = vld [vmem:[%s5331_s10 + $0x88] ss:$16 sps:$4 sm:$0xff]  }
 0x584   : > { %v2234_v52 = vpop.f32.mrb[36].mxu1  ;;  %v4195_v51 = vld [vmem:[%s5331_s10 + $0xac] ss:$16 sps:$4 sm:$0xff]  }
 0x585   : > { %v3978_v55 = vpop.f32.mrb[37].mxu1  ;;  %4001 = vmatmul.mubr.msk.bf16.vlgmr.msra.gmra.mrb[44].mxu0 %vm1779_vm1, %v2243_v50  ;;  %v4192_v50 = vld [vmem:[%s5331_s10 + $0xa4] ss:$16 sps:$4 sm:$0xff]  }
 0x586   : > { %v2237_v56 = vpop.f32.mrb[38].mxu1  ;;  %2758 = vmatpush1.bf16.msra.mxu0 %v4160_v24  ;;  %v4193_v55 = vld [vmem:[%s5331_s10 + $0xa8] ss:$16 sps:$4 sm:$0xff]  }
 0x587   : > { %v2244_v61 = vpack.c.bf16 %v2237_v56, %v2234_v52  ;;  %v3979_v62 = vpop.f32.mrb[39].mxu1  ;;  %2759 = vmatprep.subr.bf16.mxu0 %v4168_v60  ;;  %v4190_v52 = vld [vmem:[%s5331_s10 + $0xa0] ss:$16 sps:$4 sm:$0xff]   ;;  %v4198_v56 = vld [vmem:[%s5331_s10 + $0xc4] ss:$16 sps:$4 sm:$0xff]   ;;  %v4212_v24 = vld [vmem:[%s5333_s12 + $0x48] sm:$0xff]  }
 0x588   : > { %v4196_v62 = vld [vmem:[%s5331_s10 + $0xc0] ss:$16 sps:$4 sm:$0xff]  }
 0x589   : > { %4009 = vmatmul.mubr.msk.bf16.vlgmr.msra.gmra.mrb[44].mxu1 %vm1779_vm1, %v2244_v61  ;;  %v4201_v61 = vld [vmem:[%s5331_s10 + $0xcc] ss:$16 sps:$4 sm:$0xff]   ;;  %v4216_v60 = vld [vmem:[%s5333_s12 + $0x50] sm:$0xff]  }
 0x58a   : > { %2801 = vmatpush1.bf16.msra.mxu1 %v4163_v54  ;;  %2760 = vmatpush1.bf16.msra.mxu0 %v4166_v27  ;;  %v4214_v54 = vld [vmem:[%s5333_s12 + $0x8] sm:$0xff]   ;;  %v4218_v27 = vld [vmem:[%s5333_s12 + $0x10] sm:$0xff]  }
 0x58b   : > { %2802 = vmatprep.subr.bf16.mxu1 %v4171_v26  ;;  %2761 = vmatprep.subr.bf16.mxu0 %v4174_v37  ;;  %v4217_v26 = vld [vmem:[%s5333_s12 + $0xd0] sm:$0xff]   ;;  %v4228_v37 = vld [vmem:[%s5333_s12 + $0x68] sm:$0xff]  }
 0x58e   : > { %2803 = vmatpush1.bf16.msra.mxu1 %v4169_v28  ;;  %2762 = vmatpush1.bf16.msra.mxu0 %v4172_v39  ;;  %v4219_v28 = vld [vmem:[%s5333_s12 + $0x90] sm:$0xff]   ;;  %v4230_v39 = vld [vmem:[%s5333_s12 + $0x28] sm:$0xff]  }
 0x58f   : > { %2804 = vmatprep.subr.bf16.mxu1 %v4177_v38  ;;  %2763 = vmatprep.subr.bf16.mxu0 %v4180_v41  ;;  %v4229_v38 = vld [vmem:[%s5333_s12 + $0xe8] sm:$0xff]   ;;  %v4232_v41 = vld [vmem:[%s5333_s12 + $0x70] sm:$0xff]  }
 0x592   : > { %2805 = vmatpush1.bf16.msra.mxu1 %v4175_v40  ;;  %2764 = vmatpush1.bf16.msra.mxu0 %v4178_v43  ;;  %v4231_v40 = vld [vmem:[%s5333_s12 + $0xa8] sm:$0xff]   ;;  %v4234_v43 = vld [vmem:[%s5333_s12 + $0x30] sm:$0xff]  }
 0x593   : > { %2806 = vmatprep.subr.bf16.mxu1 %v4183_v42  ;;  %2765 = vmatprep.subr.bf16.mxu0 %v4186_v46  ;;  %v4233_v42 = vld [vmem:[%s5333_s12 + $0xf0] sm:$0xff]   ;;  %v4236_v46 = vld [vmem:[%s5333_s12 + $0x78] sm:$0xff]  }
 0x596   : > { %2807 = vmatpush1.bf16.msra.mxu1 %v4181_v44  ;;  %2766 = vmatpush1.bf16.msra.mxu0 %v4184_v48  ;;  %v4235_v44 = vld [vmem:[%s5333_s12 + $0xb0] sm:$0xff]   ;;  %v4238_v48 = vld [vmem:[%s5333_s12 + $0x38] sm:$0xff]  }
 0x597   : > { %2808 = vmatprep.subr.bf16.mxu1 %v4189_v47  ;;  %2767 = vmatprep.subr.bf16.mxu0 %v4192_v50  ;;  %v4237_v47 = vld [vmem:[%s5333_s12 + $0xf8] sm:$0xff]   ;;  %v2577_v50 = vlaneseq }
 0x59a   : > { %2809 = vmatpush1.bf16.msra.mxu1 %v4187_v49  ;;  %2768 = vmatpush1.bf16.msra.mxu0 %v4190_v52  ;;  %v4239_v49 = vld [vmem:[%s5333_s12 + $0xb8] sm:$0xff]  }
 0x59b   : > { %2810 = vmatprep.subr.bf16.mxu1 %v4195_v51  ;;  %2769 = vmatprep.subr.bf16.mxu0 %v4198_v56  ;;  %v2578_v51 = vshrl.u32 %v2577_v50, 7  ;;  %v2575_v56 = vld [vmem:[%s5332_s11] sm:$0xf] }
 0x59d   : > { %v2579_v52 = vsub.s32 0, %v2578_v51 }
 0x59e   : > { %2811 = vmatpush1.bf16.msra.mxu1 %v4193_v55  ;;  %2770 = vmatpush1.bf16.msra.mxu0 %v4196_v62  ;;  %v2587_v55 = vsub.s32 2, %v2578_v51  ;;  %v2591_v62 = vsub.s32 3, %v2578_v51 }
 0x59f   : > { %2812 = vmatprep.subr.bf16.mxu1 %v4201_v61  ;;  %v2583_v61 = vsub.s32 1, %v2578_v51 }
 0x638   : > { %v2310_v63 = vpop.f32.mrb[40].mxu0 }
 0x639   : > { %v3986_v0 = vpop.f32.mrb[41].mxu0 }
 0x63a   : > { %v2313_v1 = vpop.f32.mrb[42].mxu0  ;;  %v4204_v0 = vld [vmem:[%s5331_s10 + $0xe4] ss:$16 sps:$4 sm:$0xff]  }
 0x63b   : > { %v3987_v2 = vpop.f32.mrb[43].mxu0  ;;  %2771 = vmatprep.subr.bf16.mxu0 %v4204_v0  ;;  %v2588_v0 = vrot.slane %v2575_v56, %v2587_v55 }
 0x63c   : > { %v2366_v4 = vpop.f32.mrb[40].mxu1  ;;  %v4202_v2 = vld [vmem:[%s5331_s10 + $0xe0] ss:$16 sps:$4 sm:$0xff]  }
 0x63d   : > { %v2485_v3 = vadd.f32 %v2366_v4, %v2310_v63  ;;  %v3994_v5 = vpop.f32.mrb[41].mxu1  ;;  %v4199_v63 = vld [vmem:[%s5331_s10 + $0xc8] ss:$16 sps:$4 sm:$0xff]   ;;  %2772 = vmatpush1.bf16.msra.mxu0 %v4202_v2  ;;  %v2592_v2 = vrot.slane %v2575_v56, %v2591_v62 }
 0x63e   : > { %v2369_v6 = vpop.f32.mrb[42].mxu1  ;;  %2813 = vmatpush1.bf16.msra.mxu1 %v4199_v63  ;;  %v4205_v4 = vld [vmem:[%s5331_s10 + $0xe8] ss:$16 sps:$4 sm:$0xff]   ;;  %v4208_v5 = vld [vmem:[%s5333_s12 + $0x40] sm:$0xff]   ;;  %v2580_v63 = vrot.slane %v2575_v56, %v2579_v52 }
 0x63f   : > { %v2486_v7 = vadd.f32 %v2369_v6, %v2313_v1  ;;  %v3995_v8 = vpop.f32.mrb[43].mxu1  ;;  %v4207_v1 = vld [vmem:[%s5331_s10 + $0xec] ss:$16 sps:$4 sm:$0xff]   ;;  %v4209_v6 = vld [vmem:[%s5333_s12 + $0xc0] sm:$0xff]   ;;  %3648 = vmatprep.subr.bf16.mxu0 %v4208_v5 }
 0x640   : > { %2814 = vmatprep.subr.bf16.mxu1 %v4207_v1  ;;  %v2584_v1 = vrot.slane %v2575_v56, %v2583_v61 }
 0x642   : > { %2815 = vmatpush1.bf16.msra.mxu1 %v4205_v4 }
 0x643   : > { %3670 = vmatprep.subr.bf16.mxu1 %v4209_v6 }
 0x658   : > { %v2422_v9 = vpop.f32.mrb[44].mxu0 }
 0x659   : > { %v2487_v10 = vadd.f32 %v2485_v3, %v2422_v9  ;;  %v4002_v11 = vpop.f32.mrb[45].mxu0  ;;  %v4364_v3 = vmov 0  }
 0x65a   : > { %v2425_v45 = vpop.f32.mrb[46].mxu0  ;;  %2789 = vmatprep.mubr.bf16.mxu0 %v4364_v3  ;;  %2832 = vmatprep.mubr.bf16.mxu1 %v4364_v3 }
 0x65b   : > { %v2488_v12 = vadd.f32 %v2486_v7, %v2425_v45  ;;  %v4003_v13 = vpop.f32.mrb[47].mxu0 }
 0x65c   : > { %v2478_v14 = vpop.f32.mrb[44].mxu1  ;;  %v3438_v13 = vld [vmem:[%s5329_s8] ss:$0 sm:$0xff] }
 0x65d   : > { %v2489_v16 = vadd.f32 %v2487_v10, %v2478_v14  ;;  %v4010_v17 = vpop.f32.mrb[45].mxu1 }
 0x65e   : > { %v2481_v18 = vpop.f32.mrb[46].mxu1 }
 0x65f   : > { %v2498_v19 = vadd.f32 %v3437_v15, %v2489_v16  ;;  %v2490_v20 = vadd.f32 %v2488_v12, %v2481_v18  ;;  %v4011_v53 = vpop.f32.mrb[47].mxu1  ;;  %v3439_v18 = vld [vmem:[%s5330_s9] ss:$0 sm:$0xff] }
 0x661   : > { %v2499_v57 = vadd.f32 %v3437_v15, %v2490_v20  ;;  %v5046_v21 = vadd.f32 %v4296_v59, %v2498_v19  ;;  %v4211_v59 = vld [vmem:[%s5333_s12 + $0x80] sm:$0xff]  }
 0x663   : > { %2504 = vadd.xlane.f32.xlu0 %v5046_v21  ;;  %v5050_v23 = vadd.f32 %v4297_v22, %v2499_v57  ;;  %v4210_v57 = vld [vmem:[%s5333_s12] sm:$0xff]  }
 0x665   : > { %2506 = vadd.xlane.f32.xlu1 %v5050_v23 }
 0x6f0   : > { %v2505_v29 = vpop.xlane.xlu0 %2504 }
 0x6f1   : > { %v2508_v30 = vmul.f32 0.0078125, %v2505_v29  ;;  %v4220_v29 = vld [vmem:[%s5333_s12 + $0x58] sm:$0xff]  }
 0x6f2   : > { %v2507_v31 = vpop.xlane.xlu1 %2506 }
 0x6f3   : > { %v5078_v32 = vsub.f32 %v5046_v21, %v2508_v30  ;;  %v2509_v33 = vmul.f32 0.0078125, %v2507_v31  ;;  %v4221_v30 = vld [vmem:[%s5333_s12 + $0xd8] sm:$0xff]  }
 0x6f4   : > { %v4222_v31 = vld [vmem:[%s5333_s12 + $0x18] sm:$0xff]  }
 0x6f5   : > { %v5081_v34 = vsub.f32 %v5050_v23, %v2509_v33  ;;  %v2512_v35 = vmul.f32 %v5078_v32, %v5078_v32  ;;  %v4224_v33 = vld [vmem:[%s5333_s12 + $0x60] sm:$0xff]  }
 0x6f7   : > { %2514 = vadd.xlane.f32.xlu0 %v2512_v35  ;;  %v2513_v36 = vmul.f32 %v5081_v34, %v5081_v34  ;;  %v4226_v35 = vld [vmem:[%s5333_s12 + $0x20] sm:$0xff]  }
 0x6f9   : > { %2516 = vadd.xlane.f32.xlu1 %v2513_v36  ;;  %v4227_v36 = vld [vmem:[%s5333_s12 + $0xa0] sm:$0xff]  }
 0x784   : > { %v2515_v7 = vpop.xlane.xlu0 %2514 }
 0x785   : > { %v2518_v8 = vmul.f32 0.0078125, %v2515_v7 }
 0x786   : > { %v2517_v9 = vpop.xlane.xlu1 %2516 }
 0x787   : > { %v2520_v10 = vadd.f32 1e-05, %v2518_v8  ;;  %v2519_v11 = vmul.f32 0.0078125, %v2517_v9 }
 0x789   : > { %4276 = vrsqrt.f32 %v2520_v10  ;;  %v2521_v45 = vadd.f32 1e-05, %v2519_v11 }
 0x78b   : > { %4278 = vrsqrt.f32 %v2521_v45 }
 0x793   : > { %v4277_v12 = vpop.eup %4276 }
 0x794   : > { %v2524_v14 = vmul.f32 %v4277_v12, %v5078_v32  ;;  %v4223_v32 = vld [vmem:[%s5333_s12 + $0x98] sm:$0xff]  }
 0x795   : > { %v4279_v15 = vpop.eup %4278 }
 0x796   : > { %v2525_v16 = vmul.f32 %v4279_v15, %v5081_v34  ;;  %v2532_v17 = vmul.f32 %v3438_v13, %v2524_v14  ;;  %v4225_v34 = vld [vmem:[%s5333_s12 + $0xe0] sm:$0xff]  }
 0x798   : > { %v2533_v19 = vmul.f32 %v3438_v13, %v2525_v16  ;;  %v2540_v20 = vadd.f32 %v3439_v18, %v2532_v17 }
 0x79a   : > { %v2541_v53 = vadd.f32 %v3439_v18, %v2533_v19 }
 0x79c   : > { %v2542_v22 = vpack.c.bf16 %v2541_v53, %v2540_v20 }
 0x79e   : > { %2790 = vmatmul.mubr.bf16.vlgmr.msra.gmra.mrb[48].mxu0 %v2542_v22  ;;  %2833 = vmatmul.mubr.bf16.vlgmr.msra.gmra.mrb[48].mxu1 %v2542_v22 }
 0x79f   : > { %3649 = vmatpush3.bf16.msra.mxu0 %v4210_v57  ;;  %3671 = vmatpush3.bf16.msra.mxu1 %v4211_v59 }
 0x7a0   : > { %3650 = vmatprep.subr.bf16.mxu0 %v4212_v24  ;;  %3672 = vmatprep.subr.bf16.mxu1 %v4213_v25 }
 0x7a3   : > { %3651 = vmatpush3.bf16.msra.mxu0 %v4214_v54  ;;  %3673 = vmatpush3.bf16.msra.mxu1 %v4215_v58 }
 0x7a4   : > { %3652 = vmatprep.subr.bf16.mxu0 %v4216_v60  ;;  %3674 = vmatprep.subr.bf16.mxu1 %v4217_v26 }
 0x7a7   : > { %3653 = vmatpush3.bf16.msra.mxu0 %v4218_v27  ;;  %3675 = vmatpush3.bf16.msra.mxu1 %v4219_v28 }
 0x7a8   : > { %3654 = vmatprep.subr.bf16.mxu0 %v4220_v29  ;;  %3676 = vmatprep.subr.bf16.mxu1 %v4221_v30 }
 0x7ab   : > { %3655 = vmatpush3.bf16.msra.mxu0 %v4222_v31  ;;  %3677 = vmatpush3.bf16.msra.mxu1 %v4223_v32 }
 0x7ac   : > { %3656 = vmatprep.subr.bf16.mxu0 %v4224_v33  ;;  %3678 = vmatprep.subr.bf16.mxu1 %v4225_v34 }
 0x7af   : > { %3657 = vmatpush3.bf16.msra.mxu0 %v4226_v35  ;;  %3679 = vmatpush3.bf16.msra.mxu1 %v4227_v36 }
 0x7b0   : > { %3658 = vmatprep.subr.bf16.mxu0 %v4228_v37  ;;  %3680 = vmatprep.subr.bf16.mxu1 %v4229_v38 }
 0x7b3   : > { %3659 = vmatpush3.bf16.msra.mxu0 %v4230_v39  ;;  %3681 = vmatpush3.bf16.msra.mxu1 %v4231_v40 }
 0x7b4   : > { %3660 = vmatprep.subr.bf16.mxu0 %v4232_v41  ;;  %3682 = vmatprep.subr.bf16.mxu1 %v4233_v42 }
 0x7b7   : > { %3661 = vmatpush3.bf16.msra.mxu0 %v4234_v43  ;;  %3683 = vmatpush3.bf16.msra.mxu1 %v4235_v44 }
 0x7b8   : > { %3662 = vmatprep.subr.bf16.mxu0 %v4236_v46  ;;  %3684 = vmatprep.subr.bf16.mxu1 %v4237_v47 }
 0x7bb   : > { %3663 = vmatpush3.bf16.msra.mxu0 %v4238_v48  ;;  %3685 = vmatpush3.bf16.msra.mxu1 %v4239_v49 }
 0x871   : > { %v2791_v4 = vpop.f32.mrb[48].mxu0  ;;  %v2834_v3 = vpop.f32.mrb[48].mxu1 }
 0x872   : > { %v2792_v5 = vadd.f32 %v2791_v4, %v2580_v63  ;;  %v2835_v6 = vadd.f32 %v2834_v3, %v2588_v0  ;;  %v2793_v7 = vpop.f32.mrb[49].mxu0  ;;  %v2836_v8 = vpop.f32.mrb[49].mxu1  ;;  %v3472_v4 = vld [vmem:[%s5334_s13] ss:$0 sm:$0xff] }
 0x873   : > { %v2794_v9 = vadd.f32 %v2793_v7, %v2584_v1  ;;  %v2837_v10 = vadd.f32 %v2836_v8, %v2592_v2  ;;  %v2795_v11 = vpop.f32.mrb[50].mxu0  ;;  %v2838_v45 = vpop.f32.mrb[50].mxu1 }
 0x874   : > { %v2851_v12 = vmul.f32 0.70710677, %v2792_v5  ;;  %v2853_v13 = vmul.f32 0.70710677, %v2835_v6  ;;  %v2796_v16 = vadd.f32 %v2795_v11, %v2580_v63  ;;  %v2839_v17 = vadd.f32 %v2838_v45, %v2588_v0  ;;  %v2797_v18 = vpop.f32.mrb[51].mxu0  ;;  %v2840_v19 = vpop.f32.mrb[51].mxu1 }
 0x875   : > { %v2852_v14 = vmul.f32 0.70710677, %v2794_v9  ;;  %v2854_v15 = vmul.f32 0.70710677, %v2837_v10  ;;  %v2798_v20 = vadd.f32 %v2797_v18, %v2584_v1  ;;  %v2841_v53 = vadd.f32 %v2840_v19, %v2592_v2 }
 0x876   : > { %4280 = verf.f32 %v2851_v12  ;;  %v2855_v57 = vmul.f32 0.70710677, %v2796_v16  ;;  %v2857_v59 = vmul.f32 0.70710677, %v2839_v17  ;;  %v2843_v28 = vmul.f32 0.5, %v2792_v5 }
 0x877   : > { %4282 = verf.f32 %v2853_v13  ;;  %v2856_v22 = vmul.f32 0.70710677, %v2798_v20  ;;  %v2858_v24 = vmul.f32 0.70710677, %v2841_v53  ;;  %v2845_v29 = vmul.f32 0.5, %v2835_v6 }
 0x878   : > { %4284 = verf.f32 %v2852_v14  ;;  %v2844_v32 = vmul.f32 0.5, %v2794_v9  ;;  %v2847_v34 = vmul.f32 0.5, %v2796_v16  ;;  %v2846_v37 = vmul.f32 0.5, %v2837_v10 }
 0x879   : > { %4286 = verf.f32 %v2854_v15  ;;  %v2849_v39 = vmul.f32 0.5, %v2839_v17  ;;  %v2848_v44 = vmul.f32 0.5, %v2798_v20  ;;  %v2850_v49 = vmul.f32 0.5, %v2841_v53 }
 0x87a   : > { %4288 = verf.f32 %v2855_v57 }
 0x87b   : > { %4290 = verf.f32 %v2857_v59 }
 0x87c   : > { %4292 = verf.f32 %v2856_v22 }
 0x87d   : > { %4294 = verf.f32 %v2858_v24 }
 0x880   : > { %v4281_v25 = vpop.eup %4280 }
 0x881   : > { %v4283_v54 = vpop.eup %4282  ;;  %v2867_v26 = vadd.f32 1.0, %v4281_v25 }
 0x882   : > { %v4285_v58 = vpop.eup %4284  ;;  %v2869_v30 = vadd.f32 1.0, %v4283_v54 }
 0x883   : > { %v4287_v60 = vpop.eup %4286  ;;  %v2868_v33 = vadd.f32 1.0, %v4285_v58  ;;  %v2875_v42 = vmul.f32 %v2867_v26, %v2843_v28 }
 0x884   : > { %v4289_v27 = vpop.eup %4288  ;;  %v2870_v38 = vadd.f32 1.0, %v4287_v60  ;;  %v2877_v47 = vmul.f32 %v2869_v30, %v2845_v29 }
 0x885   : > { %v4291_v31 = vpop.eup %4290  ;;  %v2871_v35 = vadd.f32 1.0, %v4289_v27  ;;  %v2876_v51 = vmul.f32 %v2868_v33, %v2844_v32 }
 0x886   : > { %v4293_v36 = vpop.eup %4292  ;;  %v2873_v40 = vadd.f32 1.0, %v4291_v31  ;;  %v2878_v56 = vmul.f32 %v2870_v38, %v2846_v37 }
 0x887   : > { %v4295_v41 = vpop.eup %4294  ;;  %v2879_v43 = vmul.f32 %v2871_v35, %v2847_v34  ;;  %v2872_v46 = vadd.f32 1.0, %v4293_v36 }
 0x888   : > { %v2881_v48 = vmul.f32 %v2873_v40, %v2849_v39  ;;  %v2874_v50 = vadd.f32 1.0, %v4295_v41 }
 0x889   : > { %v2883_v52 = vpack.c.bf16 %v2879_v43, %v2875_v42  ;;  %v2880_v55 = vmul.f32 %v2872_v46, %v2848_v44 }
 0x88a   : > { %v2885_v61 = vpack.c.bf16 %v2881_v48, %v2877_v47  ;;  %v2882_v62 = vmul.f32 %v2874_v50, %v2850_v49 }
 0x88b   : > { %v2884_v63 = vpack.c.bf16 %v2880_v55, %v2876_v51 }
 0x88c   : > { %v2886_v0 = vpack.c.bf16 %v2882_v62, %v2878_v56 }
 0x88d   : > { %3182 = vmatprep.mubr.bf16.mxu0 %v2884_v63 }
 0x88e   : > { %3223 = vmatprep.mubr.bf16.mxu1 %v2886_v0  ;;  %3183 = vmatmul.mubr.bf16.vlgmr.msra.gmra.mrb[52].mxu0 %v2883_v52 }
 0x88f   : > { %3224 = vmatmul.mubr.bf16.vlgmr.msra.gmra.mrb[52].mxu1 %v2885_v61 }
 0x961   : > { %v3664_v1 = vpop.f32.mrb[52].mxu0 }
 0x962   : > { %v3686_v2 = vpop.f32.mrb[52].mxu1  ;;  %v3665_v3 = vpop.f32.mrb[53].mxu0 }
 0x963   : > { %v3666_v5 = vadd.f32 %v3665_v3, %v3664_v1  ;;  %v3687_v6 = vpop.f32.mrb[53].mxu1  ;;  %v3667_v7 = vpop.f32.mrb[54].mxu0 }
 0x964   : > { %v3688_v8 = vadd.f32 %v3687_v6, %v3686_v2  ;;  %v3689_v9 = vpop.f32.mrb[54].mxu1  ;;  %v3668_v10 = vpop.f32.mrb[55].mxu0 }
 0x965   : > { %v3185_v11 = vadd.f32 %v3666_v5, %v3472_v4  ;;  %v3669_v45 = vadd.f32 %v3668_v10, %v3667_v7  ;;  %v3690_v12 = vpop.f32.mrb[55].mxu1 }
 0x966   : > { %v3691_v13 = vadd.f32 %v3690_v12, %v3689_v9 }
 0x967   : > { %v3226_v14 = vadd.f32 %v3688_v8, %v3185_v11  ;;  %v3188_v15 = vadd.f32 %v3669_v45, %v3472_v4 }
 0x969   : > { %v3232_v16 = vadd.f32 %v3226_v14, %v5046_v21  ;;  %v3229_v17 = vadd.f32 %v3691_v13, %v3188_v15 }
 0x96b   : > { %3234 = vst [vmem:[%s460_s1] sm:$0xff] %v3232_v16  ;;  %v3233_v18 = vadd.f32 %v3229_v17, %v5050_v23 }
 0x96d   : > { %3235 = vst [vmem:[%s460_s1 + $0x8] sm:$0xff] %v3233_v18 }
 0x96e   : > { %4311 = shalt.err (!%p4308_p3)
}
 0x96f   : > { %s4312_s15 = scalar_lea.hbm %s5278_s27, 256  ;;  %s4316_s26 = scalar_lea.hbm %s5335_s14, 512 }
 0x970   : > { %p4313_p4 = scmp.ne.s32.totalorder %s5278_s27, %s4312_s15  ;;  %p4317_p9 = scmp.lt.u32.totalorder %s5278_s27, %s5335_s14 }
 0x971   : > { %p4318_p10 = scmp.lt.u32.totalorder %s4316_s26, %s4312_s15  ;;  %p4320_p12 = scmp.lt.u32.totalorder %s4312_s15, %s5278_s27 }
 0x972   : > { %p4314_p7 = pnand %p4313_p4, %p4481_p5 }
 0x973   : > { %p4319_p11 = por %p4318_p10, %p4317_p9 }
 0x974   : > { %p4315_p8 = pneg %p4314_p7 }
 0x975   : > { %p4321_p13 = por %p4320_p12, %p4319_p11 }
 0x977   : > { %p4322_p0 = pnand %p4321_p13, %p4315_p8 }
 0x979   : > { %4325 = shalt.err (!%p4322_p0)
}
 0x97a   : > { %s4366_s17 = smov 128   ;;  %s4367_s20 = smov 8  }
 0x97b   : > { %4012 = dma.vmem_to_hbm [thread:$0]  (%p4481_p5), %s5272_s21, 256, %s5278_s27, %s5280_s28, %s4366_s17, %s4366_s17, %s4367_s20  }
 0x97c PF: > { %p4018_p1 = scmp.ge.s32.totalorder %s4360_s16, 2  ;;  %s3265_s0 = sand.u32 1, %s4348_s29  }
 0x97d   : > { %s3266_s15 = scalar_lea.sflag [#allocation3], %s3265_s0 }
 0x97e   : > { %p4015_p2 = pnand %p4018_p1, %p4485_p6 }
 0x980   : > { %4343 = dma.done.wait (!%p4015_p2), %s3266_s15, 256  }
 0x981   : > { %4345 = vsyncadd (!%p4015_p2), %s3266_s15, 4294967040  ;;  %s5345_s1 = sld [smem:[#allocation5_spill]]  ;;  %s5346_s15 = sld [smem:[#allocation6_spill]] }
 0x982   : > { %p24_p3 = scmp.ge.s32.totalorder %s4468_s19, 4   ;;  %s5347_s29 = smov %s4352_s30 }
 0x983   : > { %s5349_s16 = smov %s4468_s19 }
 0x984   :  { %26 = sbr.rel (!%p24_p3) target bundleno = 6 (0x6), region = 111 }
 0x987   : > { %s5348_s30 = smov %s5345_s1 }
 0x98b   :  { %3271 = vsyncpa [#allocation3], 1 }
 0x98c   :  { %3273 = vsyncpa [#allocation3 + $0x1], 1 }

</bundles_post_ra>
